<compile_context>
chip_gen: v7x
topology: tpu7x:2x2x1
jax: 0.10.0
libtpu: 0.0.40
codegen_flags: <defaults>
</compile_context>

<pallas_src>
import functools

import jax
import jax.numpy as jnp
from jax.experimental import pallas as pl
from jax.experimental.pallas import tpu as pltpu

_LANE = 128
_COLS = 8 * _LANE                 # lane-dense 1024-wide rows for the flat path
_MIN_PALLAS_BYTES = 1 << 20       # below this, a fused jnp op is strictly faster


@functools.lru_cache(maxsize=None)
def _tpu_params():
    """(tile_bytes, vmem_limit_bytes) tuned per TPU generation."""
    try:
        vmem = pltpu.get_tpu_info().vmem_capacity_bytes
    except Exception:
        vmem = 64 * 1024 * 1024
    if vmem >= 100 * 1024 * 1024:
        # v5e / v6e: 128 MiB VMEM -> 8 MiB tiles (48 MiB double-buffered footprint).
        return 8 * 1024 * 1024, 64 * 1024 * 1024
    # v7x: 64 MiB VMEM per TC -> 6 MiB tiles (36 MiB footprint, headroom left).
    return 6 * 1024 * 1024, 48 * 1024 * 1024


def _ema_kernel(item_ref, state_ref, out_ref, *, alpha: float):
    """Elementwise EMA update on the current VMEM tile."""
    dtype = item_ref.dtype
    if jnp.issubdtype(dtype, jnp.floating) and jnp.dtype(dtype).itemsize >= 4:
        cdt = dtype
    else:
        # bf16/fp16: avoid rounding drift; int: avoid alpha truncating to 0.
        cdt = jnp.float32
    x = item_ref[...].astype(cdt)
    s = state_ref[...].astype(cdt)
    out = s + jnp.asarray(alpha, cdt) * (x - s)   # == alpha*x + (1-alpha)*s
    out_ref[...] = out.astype(out_ref.dtype)


def _pallas_ema_2d(item2, state2, alpha: float):
    """Streaming EMA over a 2-D (R, C) view; C must be a multiple of 128."""
    R, C = item2.shape
    dtype = item2.dtype
    itemsize = jnp.dtype(dtype).itemsize
    tile_bytes, vmem_limit = _tpu_params()

    sub = max(8, 32 // itemsize)                      # 8 f32 / 16 bf16 / 32 int8

    # Column tile: multiple of 128, capped at C (C % 128 == 0 on this path).
    col_budget = max(_LANE, (tile_bytes // (sub * itemsize)) // _LANE * _LANE)
    col_tile = min(C, col_budget)

    # Row tile: ~tile_bytes per block, multiple of the sublane count, <= R rounded up.
    rows_cap = pl.cdiv(R, sub) * sub
    budget_rows = max(sub, (tile_bytes // (col_tile * itemsize)) // sub * sub)
    row_tile = max(sub, min(budget_rows, rows_cap))

    # Keep >= 2 grid steps when the array is splittable so both v7x TensorCores
    # get work (no-op on single-TC v5e/v6e).
    if R > sub and pl.cdiv(R, row_tile) * pl.cdiv(C, col_tile) < 2:
        row_tile = pl.cdiv(pl.cdiv(R, 2), sub) * sub

    grid = (pl.cdiv(R, row_tile), pl.cdiv(C, col_tile))
    spec = pl.BlockSpec((row_tile, col_tile), lambda i, j: (i, j))

    return pl.pallas_call(
        functools.partial(_ema_kernel, alpha=float(alpha)),
        out_shape=jax.ShapeDtypeStruct((R, C), dtype),
        grid_spec=pltpu.PrefetchScalarGridSpec(
            num_scalar_prefetch=0,
            grid=grid,
            in_specs=[spec, spec],
            out_specs=spec,
        ),
        input_output_aliases={1: 0},   # reuse the donated state buffer as output
        compiler_params=pltpu.CompilerParams(
            dimension_semantics=("parallel", "parallel"),
            vmem_limit_bytes=vmem_limit,
        ),
    )(item2, state2)


@functools.partial(jax.jit, static_argnames=("alpha", "cols"), donate_argnums=(1,))
def _ema_pallas(item, state, *, alpha: float, cols: int):
    """Pallas path: view as (rows, cols) (free row-major reshape) and stream."""
    shape = item.shape
    rows = item.size // cols
    out2 = _pallas_ema_2d(item.reshape(rows, cols), state.reshape(rows, cols), alpha)
    return out2.reshape(shape)


@functools.partial(jax.jit, static_argnames=("alpha",), donate_argnums=(1,))
def _ema_fused(item, state, *, alpha: float):
    """Fused jnp fallback (tiny inputs / ragged tails): one HBM pass via XLA fusion."""
    dtype = item.dtype
    if jnp.issubdtype(dtype, jnp.floating) and jnp.dtype(dtype).itemsize >= 4:
        cdt = dtype
    else:
        cdt = jnp.float32
    x = item.astype(cdt)
    s = state.astype(cdt)
    return (s + jnp.asarray(alpha, cdt) * (x - s)).astype(dtype)


def ema_update(item: jax.Array, state: jax.Array, *, alpha: float) -> jax.Array:
    """out = alpha*item + (1-alpha)*state for arbitrary shapes."""
    assert item.shape == state.shape and item.dtype == state.dtype
    alpha = float(alpha)
    n = item.size
    itemsize = jnp.dtype(item.dtype).itemsize

    if n * itemsize < _MIN_PALLAS_BYTES:
        return _ema_fused(item, state, alpha=alpha)

    last = item.shape[-1] if item.ndim > 0 else 1
    if last >= _LANE and last % _LANE == 0:
        # Native layout is already lane-aligned: block directly over it.
        return _ema_pallas(item, state, alpha=alpha, cols=last)
    if n % _COLS == 0:
        # Lane-dense flat view (rows, 1024); reshape of contiguous data is free.
        return _ema_pallas(item, state, alpha=alpha, cols=_COLS)
    # TODO(synk): mask the ragged sub-1024 tail in-kernel (scalar-prefetched
    # element count + pltpu.store mask) instead of falling back to fused jnp.
    return _ema_fused(item, state, alpha=alpha)


class EMA:
    """JAX/Pallas port of stable_ssl.utils.nn_modules.EMA.

    The running buffer lives on the Python object (like UninitializedBuffer);
    the elementwise smoothing runs in the Pallas kernel.
    """

    def __init__(self, alpha: float):
        self.alpha = float(alpha)
        self.item = None  # lazily materialized buffer

    def __call__(self, item: jax.Array) -> jax.Array:
        if self.alpha < 1 and self.item is None:
            # Own a private copy (this buffer is donated on later calls).
            self.item = jnp.copy(item)
            return item
        if self.alpha >= 1:
            # alpha == 1: identity (also guards alpha > 1 from crashing).
            return item
        output = ema_update(item, self.item, alpha=self.alpha)
        self.item = output
        return output


if __name__ == "__main__":
    key = jax.random.PRNGKey(0)
    ok = True

    # --- Pallas native path: (512, 1024) f32, 2 MiB, C % 128 == 0 ------------
    ema = EMA(0.5)
    key, k0 = jax.random.split(key)
    first = jax.random.normal(k0, (512, 1024), dtype=jnp.float32)
    out0 = jax.block_until_ready(ema(first))
    ok &= bool(jnp.allclose(out0, first))
    ground = first
    for _ in range(4):
        key, k = jax.random.split(key)
        x = jax.random.normal(k, (512, 1024), dtype=jnp.float32)
        v = jax.block_until_ready(ema(x))
        ground = 0.5 * x + 0.5 * ground
        ok &= bool(jnp.allclose(v, ground, atol=1e-5))

    # --- Pallas native path with a ragged row block: (520, 1024) f32 ---------
    ema_r = EMA(0.25)
    key, k = jax.random.split(key)
    r = jax.random.normal(k, (520, 1024), dtype=jnp.float32)
    _ = ema_r(r)
    g = r
    for _ in range(3):
        key, k = jax.random.split(key)
        x = jax.random.normal(k, (520, 1024), dtype=jnp.float32)
        v = jax.block_until_ready(ema_r(x))
        g = 0.25 * x + 0.75 * g
        ok &= bool(jnp.allclose(v, g, atol=1e-5))

    # --- Pallas flat path: (1024, 500) f32, last dim not %128, n % 1024 == 0 -
    ema_f = EMA(0.5)
    key, k = jax.random.split(key)
    r = jax.random.normal(k, (1024, 500), dtype=jnp.float32)
    _ = ema_f(r)
    g = r
    for _ in range(3):
        key, k = jax.random.split(key)
        x = jax.random.normal(k, (1024, 500), dtype=jnp.float32)
        v = jax.block_until_ready(ema_f(x))
        g = 0.5 * x + 0.5 * g
        ok &= bool(jnp.allclose(v, g, atol=1e-5))

    # --- Small / unaligned shape (10, 10), like the PyTorch _test ------------
    ema_s = EMA(0.5)
    key, k = jax.random.split(key)
    r = jax.random.normal(k, (10, 10), dtype=jnp.float32)
    _ = ema_s(r)
    g = r
    for _ in range(3):
        key, k = jax.random.split(key)
        x = jax.random.normal(k, (10, 10), dtype=jnp.float32)
        v = jax.block_until_ready(ema_s(x))
        g = 0.5 * x + 0.5 * g
        ok &= bool(jnp.allclose(v, g, atol=1e-6))

    # --- alpha = 0: always returns the first value ----------------------------
    ema0 = EMA(0.0)
    key, k = jax.random.split(key)
    r0 = jax.random.normal(k, (512, 1024), dtype=jnp.float32)
    _ = ema0(r0)
    r0_val = jnp.copy(r0)
    for _ in range(2):
        key, k = jax.random.split(key)
        v = jax.block_until_ready(ema0(jax.random.normal(k, (512, 1024), jnp.float32)))
        ok &= bool(jnp.allclose(v, r0_val, atol=1e-6))

    # --- alpha = 1: identity ---------------------------------------------------
    ema1 = EMA(1.0)
    key, k = jax.random.split(key)
    x = jax.random.normal(k, (16, 256), dtype=jnp.float32)
    v = jax.block_until_ready(ema1(x))
    ok &= bool(jnp.allclose(v, x))

    # --- bf16 Pallas path: 16-row sublane tiling + f32 internal blend ---------
    emab = EMA(0.5)
    key, k = jax.random.split(key)
    fb = jax.random.normal(k, (512, 1280), dtype=jnp.bfloat16)
    _ = emab(fb)
    gb = fb.astype(jnp.float32)
    for _ in range(2):
        key, k = jax.random.split(key)
        xb = jax.random.normal(k, (512, 1280), dtype=jnp.bfloat16)
        vb = jax.block_until_ready(emab(xb))
        gb = 0.5 * xb.astype(jnp.float32) + 0.5 * gb
        ok &= bool(jnp.allclose(vb.astype(jnp.float32), gb, atol=5e-2))

    if ok:
        print("KERNEL_OK")
    else:
        raise SystemExit("EMA kernel mismatch vs reference")
</pallas_src>

<mosaic_0001>
module attributes {stable_mosaic.version = 11 : i64} {
  func.func @_ema_kernel(%arg0: i32, %arg1: i32, %arg2: memref<256x1024xf32, #tpu.memory_space<vmem>>, %arg3: memref<256x1024xf32, #tpu.memory_space<vmem>>, %arg4: memref<256x1024xf32, #tpu.memory_space<vmem>>) attributes {dimension_semantics = [#tpu.dimension_semantics<parallel>, #tpu.dimension_semantics<parallel>], iteration_bounds = array<i64: 2, 1>, scalar_prefetch = 0 : i64, scratch_operands = 0 : i64, tpu.core_type = #tpu.core_type<tc>, window_params = [{transform_indices = @transform_0, window_bounds = array<i64: 256, 1024>}, {transform_indices = @transform_1, window_bounds = array<i64: 256, 1024>}, {transform_indices = @transform_2, window_bounds = array<i64: 256, 1024>}]} {
    %c0 = arith.constant 0 : index
    %c0_0 = arith.constant 0 : index
    %0 = vector.load %arg2[%c0, %c0_0] : memref<256x1024xf32, #tpu.memory_space<vmem>>, vector<256x1024xf32>
    %c0_1 = arith.constant 0 : index
    %c0_2 = arith.constant 0 : index
    %1 = vector.load %arg3[%c0_1, %c0_2] : memref<256x1024xf32, #tpu.memory_space<vmem>>, vector<256x1024xf32>
    %2 = arith.subf %0, %1 : vector<256x1024xf32>
    %cst = arith.constant 5.000000e-01 : f32
    %3 = vector.broadcast %cst : f32 to vector<256x1024xf32>
    %4 = arith.mulf %3, %2 : vector<256x1024xf32>
    %5 = arith.addf %1, %4 : vector<256x1024xf32>
    %c0_3 = arith.constant 0 : index
    %c0_4 = arith.constant 0 : index
    %6 = vector.load %arg4[%c0_3, %c0_4] : memref<256x1024xf32, #tpu.memory_space<vmem>>, vector<256x1024xf32>
    tpu.vector_store %arg4[%c0_3, %c0_4], %5 {strides = array<i32>} : memref<256x1024xf32, #tpu.memory_space<vmem>>, vector<256x1024xf32>,
    return
  }
  func.func @transform_0(%arg0: i32, %arg1: i32) -> (i32, i32) {
    %c0_i32 = arith.constant 0 : i32
    return %arg0, %arg1 : i32, i32
  }
  func.func @transform_1(%arg0: i32, %arg1: i32) -> (i32, i32) {
    %c0_i32 = arith.constant 0 : i32
    return %arg0, %arg1 : i32, i32
  }
  func.func @transform_2(%arg0: i32, %arg1: i32) -> (i32, i32) {
    %c0_i32 = arith.constant 0 : i32
    return %arg0, %arg1 : i32, i32
  }
}

</mosaic_0001>

<bundles_post_ra>
// kernel: _ema_pallas.1
= control target key start
LH: loop header
LB: loop body
LE: loop exit
PB: predicated region body
PF: predicated region fallthrough
CT: control target
= control target key end

     0   :  { %7 = vsyncpa [#allocation3], 0  ;;  %s3183_s0 = inlined_call_operand.hbm [shape: f32[512,1024], index: 0, kind: input, shape index: {}]   ;;  %s3184_s1 = inlined_call_operand.hbm [shape: f32[512,1024], index: 1, kind: input, shape index: {}, may-alias: {1,2}]   ;;  %s3185_s2 = inlined_call_operand.hbm [shape: f32[512,1024], index: 2, kind: output, shape index: {}, may-alias: {1,2}]  }
   0x1   :  { %9 = vsyncpa [#allocation3 + $0x1], 0 }
   0x2   :  { %10 = vsyncpa [#allocation6], 0 }
   0x3   :  { %12 = vsyncpa [#allocation6 + $0x1], 0 }
   0x4   :  { %13 = vsyncpa [#allocation4], 0 }
   0x5   :  { %15 = vsyncpa [#allocation4 + $0x1], 0  ;;  %s2167_s9 = smov 0   ;;  %s2169_s10 = smov 0  }
   0x6   :  { %s2171_s11 = smov 0   ;;  %s2173_s12 = smov 0  }
   0x7   :  { %s2175_s13 = smov 0   ;;  %s2177_s14 = smov 0  }
   0x8 LB: > { %s1898_s15 = sadd.s32 4294967295, %s2143_s14   ;;  %s1899_s16 = sadd.s32 4294967294, %s2143_s14   ;;  %s2143_s14 = sphi %s2177_s14, %s21_s14   ;;  %s2139_s13 = sphi %s2175_s13, %s3203_s13   ;;  %s2135_s12 = sphi %s2173_s12, %s3202_s12   ;;  %s2131_s11 = sphi %s2171_s11, %s3201_s11   ;;  %s2127_s10 = sphi %s2169_s10, %s3200_s10   ;;  %s2123_s9 = sphi %s2167_s9, %s3199_s9  }
   0x9   : > { %s33_s17 = sadd.s32 1, %s2139_s13  ;;  %s42_s18 = sadd.s32 1, %s2131_s11 }
   0xa   : > { %p35_p0 = scmp.ge.s32.totalorder %s33_s17, 2  ;;  %p49_p1 = scmp.ne.s32.totalorder %s2131_s11, %s2127_s10 }
   0xb   : > { %p50_p2 = scmp.eq.s32.totalorder %s2143_s14, 0  ;;  %p55_p3 = scmp.ne.s32.totalorder %s2127_s10, %s2123_s9 }
   0xc   : > { %s3205_s17 = smov (%p35_p0, %s33_s17), 0  ;;  %p56_p5 = scmp.eq.s32.totalorder %s1898_s15, 0 }
   0xd   : > { %p2208_p4 = por %p50_p2, %p49_p1  ;;  %s37_s20 = ssub.s32 %s2139_s13, %s3205_s17 }
   0xe   : > { %p109_p6 = scmp.eq.s32.totalorder %s1898_s15, 1  ;;  %p40_p7 = scmp.eq.s32.totalorder %s37_s20, 0 }
   0xf   : > { %p2214_p8 = por %p56_p5, %p55_p3  ;;  %p115_p10 = scmp.eq.s32.totalorder %s1899_s16, 1 }
  0x10   : > { %p2218_p9 = por %p109_p6, %p49_p1  ;;  %p1943_p13 = scmp.lt.s32.totalorder %s2143_s14, 2 }
  0x11   : > { %s3189_s21 = scalar_select %p2214_p8, 1, 0 }
  0x12   : > { %s3190_s22 = scalar_select %p2218_p9, 1, 0 }
  0x13   : > { %s2223_s23 = scalar_select %p40_p7, %s2131_s11, %s42_s18  }
  0x14   : > { %p2225_p11 = por %p115_p10, %p55_p3  ;;  %s2232_s25 = sand.u32 1, %s2131_s11  }
  0x15   : > { %s1902_s26 = sshll.u32 %s2232_s25, 11  ;;  %s1921_s27 = sshll.u32 %s2139_s13, 15 }
  0x16   : > { %s3191_s24 = scalar_select %p2225_p11, 1, 0 }
  0x17   : > { %s2241_s30 = scalar_lea.hbm %s3183_s0, %s1921_s27  ;;  %s139_s3 = scalar_lea.vmem [#allocation2], %s1902_s26 }
  0x18   : > { %s149_s4 = sshll.u32 %s139_s3, 4  ;;  %p2249_p0 = pnand %p1943_p13, %p2208_p4  ;;  %s2245_s4 = int_to_ptr.vmem [resolvable:$true] %s149_s4 }
  0x19   : > { %s136_s6 = scalar_lea.sflag [#allocation3], %s2232_s25  ;;  %s1997_s7 = scalar_lea.hbm %s2241_s30, 32768 }
  0x1a   : > { %p1998_p2 = scmp.ne.s32.totalorder %s2241_s30, %s1997_s7  ;;  %p1999_p3 = pneg %p2249_p0 }
  0x1b   : > { %s2002_s16 = scalar_lea.hbm %s3183_s0, 65536  ;;  %p2003_p4 = scmp.lt.u32.totalorder %s2241_s30, %s3183_s0 }
  0x1c   : > { %p2000_p5 = pnand %p1999_p3, %p1998_p2  ;;  %p2004_p7 = scmp.lt.u32.totalorder %s2002_s16, %s1997_s7 }
  0x1d   : > { %p2006_p13 = scmp.lt.u32.totalorder %s1997_s7, %s2241_s30 }
  0x1e   : > { %p2001_p6 = pneg %p2000_p5  ;;  %p2005_p10 = por %p2004_p7, %p2003_p4 }
  0x20   : > { %p2007_p12 = por %p2006_p13, %p2005_p10 }
  0x22   : > { %p2008_p1 = pnand %p2007_p12, %p2001_p6 }
  0x24   : > { %2011 = shalt.err (!%p2008_p1)
}
  0x25   : > { %s2012_s20 = scalar_lea.vmem %s2245_s4, 32768  ;;  %s2145_s28 = smov [#allocation2]  }
  0x26   : > { %p2013_p2 = scmp.ne.s32.totalorder %s2245_s4, %s2012_s20  ;;  %s2017_s29 = sshll.u32 %s2145_s28, 4  ;;  %s2018_s29 = int_to_ptr.vmem [resolvable:$false] %s2017_s29 }
  0x27   : > { %s2019_s3 = scalar_lea.vmem %s2018_s29, 65536  ;;  %p2020_p9 = scmp.lt.s32.totalorder %s2245_s4, %s2018_s29 }
  0x28   : > { %p2015_p5 = pnand %p2013_p2, %p1999_p3  ;;  %p2021_p4 = scmp.lt.s32.totalorder %s2019_s3, %s2012_s20 }
  0x2a   : > { %p2016_p11 = pneg %p2015_p5  ;;  %p2022_p7 = por %p2021_p4, %p2020_p9 }
  0x2c   : > { %p2023_p10 = pnand %p2022_p7, %p2016_p11 }
  0x2e   : > { %2026 = shalt.err (!%p2023_p10)
}
  0x2f   : > { %s2146_s7 = smov 1024   ;;  %s2147_s8 = smov 64  }
  0x30   : > { %1935 = dma.hbm_to_vmem [thread:$0]  (!%p2249_p0), %s2241_s30, 32768, %s2245_s4, %s136_s6, %s2146_s7, %s2146_s7, %s2147_s8  }
  0x31   : > { %p181_p9 = scmp.lt.s32.totalorder %s2143_s14, 3  ;;  %s2291_s18 = scalar_lea.hbm %s3184_s1, %s1921_s27 }
  0x32   : > { %p3193_p11 = scmp.ge.s32.totalorder %s2143_s14, 1  ;;  %s163_s20 = scalar_lea.vmem [#allocation5], %s1902_s26 }
  0x33   : > { %s173_s28 = sshll.u32 %s163_s20, 4  ;;  %s160_s30 = scalar_lea.sflag [#allocation6], %s2232_s25  ;;  %s2301_s28 = int_to_ptr.vmem [resolvable:$true] %s173_s28 }
  0x34   : > { %p2295_p12 = pnand %p3193_p11, %p181_p9  ;;  %s2027_s4 = scalar_lea.hbm %s2291_s18, 32768 }
  0x35   : > { %p2028_p1 = scmp.ne.s32.totalorder %s2291_s18, %s2027_s4  ;;  %s2032_s29 = scalar_lea.hbm %s3184_s1, 65536 }
  0x36   : > { %p2033_p2 = scmp.lt.u32.totalorder %s2291_s18, %s3184_s1  ;;  %p2034_p5 = scmp.lt.u32.totalorder %s2032_s29, %s2027_s4 }
  0x37   : > { %p2030_p6 = pnand %p2028_p1, %p1999_p3  ;;  %p2036_p7 = scmp.lt.u32.totalorder %s2027_s4, %s2291_s18 }
  0x38   : > { %p2035_p4 = por %p2034_p5, %p2033_p2 }
  0x39   : > { %p2031_p13 = pneg %p2030_p6 }
  0x3a   : > { %p2037_p10 = por %p2036_p7, %p2035_p4 }
  0x3c   : > { %p2038_p9 = pnand %p2037_p10, %p2031_p13 }
  0x3e   : > { %2041 = shalt.err (!%p2038_p9)
}
  0x3f   : > { %s2042_s26 = scalar_lea.vmem %s2301_s28, 32768  ;;  %s2148_s16 = smov [#allocation5]  }
  0x40   : > { %p2043_p11 = scmp.ne.s32.totalorder %s2301_s28, %s2042_s26  ;;  %s2047_s20 = sshll.u32 %s2148_s16, 4  ;;  %s2048_s20 = int_to_ptr.vmem [resolvable:$false] %s2047_s20 }
  0x41   : > { %s2049_s27 = scalar_lea.vmem %s2048_s20, 65536  ;;  %p2050_p8 = scmp.lt.s32.totalorder %s2301_s28, %s2048_s20 }
  0x42   : > { %p2045_p1 = pnand %p2043_p11, %p1999_p3  ;;  %p2051_p2 = scmp.lt.s32.totalorder %s2049_s27, %s2042_s26 }
  0x44   : > { %p2046_p6 = pneg %p2045_p1  ;;  %p2052_p5 = por %p2051_p2, %p2050_p8 }
  0x46   : > { %p2053_p4 = pnand %p2052_p5, %p2046_p6 }
  0x48   : > { %2056 = shalt.err (!%p2053_p4)
}
  0x49   : > { %1938 = dma.hbm_to_vmem [thread:$0]  (!%p2249_p0), %s2291_s18, 32768, %s2301_s28, %s160_s30, %s2146_s7, %s2146_s7, %s2147_s8  }
  0x4a   : > { %185 = sbr.rel (%p2295_p12) target bundleno = 298 (0x12a), region = 28  ;;  %s2335_s4 = sand.u32 (!%p2295_p12), 1, %s2127_s10  }
  0x4b   : > { %s2338_s6 = sshll.u32 (!%p2295_p12), %s2335_s4, 11  ;;  %s188_s5 = scalar_lea.sflag (!%p2295_p12), [#allocation3], %s2335_s4 }
  0x4c   : > { %s2342_s29 = scalar_lea.vmem (!%p2295_p12), [#allocation2], %s2338_s6  ;;  %p3195_p8 = scmp.ne.s32.totalorder (!%p2295_p12), %s3189_s21, 0 }
  0x51   : > { %2110 = dma.done.wait (%p3195_p8), %s188_s5, 32768  }
  0x52   : > { %2112 = vsyncadd (%p3195_p8), %s188_s5, 4294934528  ;;  %s197_s25 = scalar_lea.sflag [#allocation6], %s2335_s4  ;;  %s2350_s7 = scalar_lea.vmem [#allocation5], %s2338_s6 }
  0x53   : > { %2114 = dma.done.wait (%p3195_p8), %s197_s25, 32768  }
  0x54   : > { %2116 = vsyncadd (%p3195_p8), %s197_s25, 4294934528  ;;  %v232_v0 = vld [vmem:[%s2342_s29] sm:$0xff]  ;;  %v233_v2 = vld [vmem:[%s2342_s29 + $0x8] sm:$0xff]  ;;  %s2378_s21 = scalar_lea.vmem [#allocation7], %s2338_s6  ;;  %s1925_s8 = sshll.u32 %s2135_s12, 15 }
  0x55   : > { %v488_v1 = vld [vmem:[%s2350_s7] sm:$0xff]  ;;  %v489_v4 = vld [vmem:[%s2350_s7 + $0x8] sm:$0xff]  ;;  %v234_v5 = vld [vmem:[%s2342_s29 + $0x10] sm:$0xff]  ;;  %s1785_s18 = sshll.u32 %s2378_s21, 4  ;;  %s3130_s30 = scalar_lea.hbm %s3185_s2, %s1925_s8  ;;  %s3132_s18 = int_to_ptr.vmem [resolvable:$true] %s1785_s18 }
  0x56   : > { %v744_v3 = vsub.f32 %v232_v0, %v488_v1  ;;  %v490_v6 = vld [vmem:[%s2350_s7 + $0x10] sm:$0xff]  ;;  %v745_v7 = vsub.f32 %v233_v2, %v489_v4  ;;  %v235_v9 = vld [vmem:[%s2342_s29 + $0x18] sm:$0xff]  ;;  %v236_v11 = vld [vmem:[%s2342_s29 + $0x20] sm:$0xff]  ;;  %s1769_s12 = scalar_lea.sflag [#allocation4], %s2335_s4  ;;  %s2057_s3 = scalar_lea.vmem %s3132_s18, 32768 }
  0x57   : > { %v746_v8 = vsub.f32 %v234_v5, %v490_v6  ;;  %v491_v10 = vld [vmem:[%s2350_s7 + $0x18] sm:$0xff]  ;;  %v492_v14 = vld [vmem:[%s2350_s7 + $0x20] sm:$0xff]  ;;  %v237_v15 = vld [vmem:[%s2342_s29 + $0x28] sm:$0xff]  ;;  %p2058_p0 = scmp.ne.s32.totalorder %s3132_s18, %s2057_s3  ;;  %p3196_p3 = scmp.ne.s32.totalorder %s3190_s22, 0 }
  0x58   : > { %v1000_v12 = vmul.f32 0.5, %v744_v3  ;;  %v747_v13 = vsub.f32 %v235_v9, %v491_v10  ;;  %v493_v16 = vld [vmem:[%s2350_s7 + $0x28] sm:$0xff]  ;;  %v1001_v17 = vmul.f32 0.5, %v745_v7  ;;  %v748_v19 = vsub.f32 %v236_v11, %v492_v14  ;;  %v238_v21 = vld [vmem:[%s2342_s29 + $0x30] sm:$0xff]  ;;  %v239_v23 = vld [vmem:[%s2342_s29 + $0x38] sm:$0xff]  ;;  %s2149_s15 = smov [#allocation7]  }
  0x59   : > { %v1002_v18 = vmul.f32 0.5, %v746_v8  ;;  %v749_v20 = vsub.f32 %v237_v15, %v493_v16  ;;  %v494_v22 = vld [vmem:[%s2350_s7 + $0x30] sm:$0xff]  ;;  %v495_v27 = vld [vmem:[%s2350_s7 + $0x38] sm:$0xff]  ;;  %v240_v28 = vld [vmem:[%s2342_s29 + $0x40] sm:$0xff]  ;;  %p2059_p12 = pnand %p2058_p0, %p3196_p3  ;;  %s2061_s26 = sshll.u32 %s2149_s15, 4  ;;  %s2062_s26 = int_to_ptr.vmem [resolvable:$false] %s2061_s26 }
  0x5a   : > { %v1256_v24 = vadd.f32 %v1000_v12, %v488_v1  ;;  %v1003_v25 = vmul.f32 0.5, %v747_v13  ;;  %v750_v26 = vsub.f32 %v238_v21, %v494_v22  ;;  %v496_v29 = vld [vmem:[%s2350_s7 + $0x40] sm:$0xff]  ;;  %v1257_v30 = vadd.f32 %v1001_v17, %v489_v4  ;;  %v241_v34 = vld [vmem:[%s2342_s29 + $0x48] sm:$0xff]  ;;  %v242_v36 = vld [vmem:[%s2342_s29 + $0x50] sm:$0xff]  ;;  %s2063_s16 = scalar_lea.vmem %s2062_s26, 65536  ;;  %p2064_p7 = scmp.lt.s32.totalorder %s3132_s18, %s2062_s26 }
  0x5b   : > { %v1258_v31 = vadd.f32 %v1002_v18, %v490_v6  ;;  %v1004_v32 = vmul.f32 0.5, %v748_v19  ;;  %v1005_v33 = vmul.f32 0.5, %v749_v20  ;;  %v497_v35 = vld [vmem:[%s2350_s7 + $0x48] sm:$0xff]  ;;  %v751_v39 = vsub.f32 %v239_v23, %v495_v27  ;;  %v498_v41 = vld [vmem:[%s2350_s7 + $0x50] sm:$0xff]  ;;  %v243_v42 = vld [vmem:[%s2342_s29 + $0x58] sm:$0xff]  ;;  %p2060_p13 = pneg %p2059_p12  ;;  %p2065_p10 = scmp.lt.s32.totalorder %s2063_s16, %s2057_s3 }
  0x5c   : > { %1512 = vst [vmem:[%s2378_s21] sm:$0xff] %v1256_v24  ;;  %v1259_v37 = vadd.f32 %v1003_v25, %v491_v10  ;;  %v1006_v38 = vmul.f32 0.5, %v750_v26  ;;  %v752_v40 = vsub.f32 %v240_v28, %v496_v29  ;;  %v499_v43 = vld [vmem:[%s2350_s7 + $0x58] sm:$0xff]  ;;  %1513 = vst [vmem:[%s2378_s21 + $0x8] sm:$0xff] %v1257_v30  ;;  %v753_v46 = vsub.f32 %v241_v34, %v497_v35  ;;  %v244_v48 = vld [vmem:[%s2342_s29 + $0x60] sm:$0xff] }
  0x5d   : > { %1514 = vst [vmem:[%s2378_s21 + $0x10] sm:$0xff] %v1258_v31  ;;  %v1260_v44 = vadd.f32 %v1004_v32, %v492_v14  ;;  %v1261_v45 = vadd.f32 %v1005_v33, %v493_v16  ;;  %v754_v47 = vsub.f32 %v242_v36, %v498_v41  ;;  %v500_v49 = vld [vmem:[%s2350_s7 + $0x60] sm:$0xff]  ;;  %v245_v50 = vld [vmem:[%s2342_s29 + $0x68] sm:$0xff]  ;;  %v1007_v52 = vmul.f32 0.5, %v751_v39  ;;  %v246_v56 = vld [vmem:[%s2342_s29 + $0x70] sm:$0xff]  ;;  %p2066_p9 = por %p2065_p10, %p2064_p7 }
  0x5e   : > { %1515 = vst [vmem:[%s2378_s21 + $0x18] sm:$0xff] %v1259_v37  ;;  %v1262_v51 = vadd.f32 %v1006_v38, %v494_v22  ;;  %v1008_v53 = vmul.f32 0.5, %v752_v40  ;;  %v755_v54 = vsub.f32 %v243_v42, %v499_v43  ;;  %v501_v55 = vld [vmem:[%s2350_s7 + $0x68] sm:$0xff]  ;;  %v502_v57 = vld [vmem:[%s2350_s7 + $0x70] sm:$0xff]  ;;  %v1009_v58 = vmul.f32 0.5, %v753_v46  ;;  %v247_v62 = vld [vmem:[%s2342_s29 + $0x78] sm:$0xff] }
  0x5f   : > { %1516 = vst [vmem:[%s2378_s21 + $0x20] sm:$0xff] %v1260_v44  ;;  %1517 = vst [vmem:[%s2378_s21 + $0x28] sm:$0xff] %v1261_v45  ;;  %v1010_v59 = vmul.f32 0.5, %v754_v47  ;;  %v756_v60 = vsub.f32 %v244_v48, %v500_v49  ;;  %v757_v61 = vsub.f32 %v245_v50, %v501_v55  ;;  %v503_v63 = vld [vmem:[%s2350_s7 + $0x78] sm:$0xff]  ;;  %v248_v0 = vld [vmem:[%s2342_s29 + $0x80] sm:$0xff]  ;;  %v1263_v1 = vadd.f32 %v1007_v52, %v495_v27  ;;  %p2067_p11 = pnand %p2066_p9, %p2060_p13 }
  0x60   : > { %1518 = vst [vmem:[%s2378_s21 + $0x30] sm:$0xff] %v1262_v51  ;;  %v1264_v2 = vadd.f32 %v1008_v53, %v496_v29  ;;  %v1011_v3 = vmul.f32 0.5, %v755_v54  ;;  %v758_v4 = vsub.f32 %v246_v56, %v502_v57  ;;  %v504_v5 = vld [vmem:[%s2350_s7 + $0x80] sm:$0xff]  ;;  %v249_v6 = vld [vmem:[%s2342_s29 + $0x88] sm:$0xff]  ;;  %v1265_v8 = vadd.f32 %v1009_v58, %v497_v35  ;;  %v250_v12 = vld [vmem:[%s2342_s29 + $0x90] sm:$0xff] }
  0x61   : > { %v505_v7 = vld [vmem:[%s2350_s7 + $0x88] sm:$0xff]  ;;  %v1266_v9 = vadd.f32 %v1010_v59, %v498_v41  ;;  %v1012_v10 = vmul.f32 0.5, %v756_v60  ;;  %v1013_v11 = vmul.f32 0.5, %v757_v61  ;;  %v506_v13 = vld [vmem:[%s2350_s7 + $0x90] sm:$0xff]  ;;  %v251_v14 = vld [vmem:[%s2342_s29 + $0x98] sm:$0xff]  ;;  %1519 = vst [vmem:[%s2378_s21 + $0x38] sm:$0xff] %v1263_v1  ;;  %v759_v17 = vsub.f32 %v247_v62, %v503_v63 }
  0x62   : > { %1520 = vst [vmem:[%s2378_s21 + $0x40] sm:$0xff] %v1264_v2  ;;  %v1267_v15 = vadd.f32 %v1011_v3, %v499_v43  ;;  %v1014_v16 = vmul.f32 0.5, %v758_v4  ;;  %v760_v18 = vsub.f32 %v248_v0, %v504_v5  ;;  %v507_v19 = vld [vmem:[%s2350_s7 + $0x98] sm:$0xff]  ;;  %v252_v20 = vld [vmem:[%s2342_s29 + $0xa0] sm:$0xff]  ;;  %1521 = vst [vmem:[%s2378_s21 + $0x48] sm:$0xff] %v1265_v8  ;;  %v761_v24 = vsub.f32 %v249_v6, %v505_v7 }
  0x63   : > { %v508_v21 = vld [vmem:[%s2350_s7 + $0xa0] sm:$0xff]  ;;  %1522 = vst [vmem:[%s2378_s21 + $0x50] sm:$0xff] %v1266_v9  ;;  %v1268_v22 = vadd.f32 %v1012_v10, %v500_v49  ;;  %v1269_v23 = vadd.f32 %v1013_v11, %v501_v55  ;;  %v762_v25 = vsub.f32 %v250_v12, %v506_v13  ;;  %v253_v26 = vld [vmem:[%s2342_s29 + $0xa8] sm:$0xff]  ;;  %v254_v28 = vld [vmem:[%s2342_s29 + $0xb0] sm:$0xff]  ;;  %v1015_v30 = vmul.f32 0.5, %v759_v17 }
  0x64   : > { %v509_v27 = vld [vmem:[%s2350_s7 + $0xa8] sm:$0xff]  ;;  %1523 = vst [vmem:[%s2378_s21 + $0x58] sm:$0xff] %v1267_v15  ;;  %v1270_v29 = vadd.f32 %v1014_v16, %v502_v57  ;;  %v1016_v31 = vmul.f32 0.5, %v760_v18  ;;  %v763_v32 = vsub.f32 %v251_v14, %v507_v19  ;;  %v510_v33 = vld [vmem:[%s2350_s7 + $0xb0] sm:$0xff]  ;;  %v255_v34 = vld [vmem:[%s2342_s29 + $0xb8] sm:$0xff]  ;;  %v1017_v36 = vmul.f32 0.5, %v761_v24 }
  0x65   : > { %v511_v35 = vld [vmem:[%s2350_s7 + $0xb8] sm:$0xff]  ;;  %1524 = vst [vmem:[%s2378_s21 + $0x60] sm:$0xff] %v1268_v22  ;;  %1525 = vst [vmem:[%s2378_s21 + $0x68] sm:$0xff] %v1269_v23  ;;  %v1018_v37 = vmul.f32 0.5, %v762_v25  ;;  %v764_v38 = vsub.f32 %v252_v20, %v508_v21  ;;  %v765_v39 = vsub.f32 %v253_v26, %v509_v27  ;;  %v256_v40 = vld [vmem:[%s2342_s29 + $0xc0] sm:$0xff]  ;;  %v1271_v43 = vadd.f32 %v1015_v30, %v503_v63 }
  0x66   : > { %v512_v41 = vld [vmem:[%s2350_s7 + $0xc0] sm:$0xff]  ;;  %v257_v42 = vld [vmem:[%s2342_s29 + $0xc8] sm:$0xff]  ;;  %1526 = vst [vmem:[%s2378_s21 + $0x70] sm:$0xff] %v1270_v29  ;;  %v1272_v44 = vadd.f32 %v1016_v31, %v504_v5  ;;  %v1019_v45 = vmul.f32 0.5, %v763_v32  ;;  %v766_v46 = vsub.f32 %v254_v28, %v510_v33  ;;  %v258_v48 = vld [vmem:[%s2342_s29 + $0xd0] sm:$0xff]  ;;  %v1273_v50 = vadd.f32 %v1017_v36, %v505_v7 }
  0x67   : > { %v513_v47 = vld [vmem:[%s2350_s7 + $0xc8] sm:$0xff]  ;;  %v514_v49 = vld [vmem:[%s2350_s7 + $0xd0] sm:$0xff]  ;;  %v1274_v51 = vadd.f32 %v1018_v37, %v506_v13  ;;  %v1020_v52 = vmul.f32 0.5, %v764_v38  ;;  %v1021_v53 = vmul.f32 0.5, %v765_v39  ;;  %v259_v54 = vld [vmem:[%s2342_s29 + $0xd8] sm:$0xff]  ;;  %1527 = vst [vmem:[%s2378_s21 + $0x78] sm:$0xff] %v1271_v43  ;;  %v767_v59 = vsub.f32 %v255_v34, %v511_v35 }
  0x68   : > { %v515_v55 = vld [vmem:[%s2350_s7 + $0xd8] sm:$0xff]  ;;  %v260_v56 = vld [vmem:[%s2342_s29 + $0xe0] sm:$0xff]  ;;  %1528 = vst [vmem:[%s2378_s21 + $0x80] sm:$0xff] %v1272_v44  ;;  %v1275_v57 = vadd.f32 %v1019_v45, %v507_v19  ;;  %v1022_v58 = vmul.f32 0.5, %v766_v46  ;;  %v768_v60 = vsub.f32 %v256_v40, %v512_v41  ;;  %v261_v62 = vld [vmem:[%s2342_s29 + $0xe8] sm:$0xff]  ;;  %v769_v2 = vsub.f32 %v257_v42, %v513_v47 }
  0x69   : > { %v516_v61 = vld [vmem:[%s2350_s7 + $0xe0] sm:$0xff]  ;;  %v517_v63 = vld [vmem:[%s2350_s7 + $0xe8] sm:$0xff]  ;;  %1529 = vst [vmem:[%s2378_s21 + $0x88] sm:$0xff] %v1273_v50  ;;  %1530 = vst [vmem:[%s2378_s21 + $0x90] sm:$0xff] %v1274_v51  ;;  %v1276_v0 = vadd.f32 %v1020_v52, %v508_v21  ;;  %v1277_v1 = vadd.f32 %v1021_v53, %v509_v27  ;;  %v770_v3 = vsub.f32 %v258_v48, %v514_v49  ;;  %v1023_v7 = vmul.f32 0.5, %v767_v59 }
  0x6a   : > { %v262_v4 = vld [vmem:[%s2342_s29 + $0xf0] sm:$0xff]  ;;  %1531 = vst [vmem:[%s2378_s21 + $0x98] sm:$0xff] %v1275_v57  ;;  %v1278_v6 = vadd.f32 %v1022_v58, %v510_v33  ;;  %v1024_v8 = vmul.f32 0.5, %v768_v60  ;;  %v771_v9 = vsub.f32 %v259_v54, %v515_v55  ;;  %v263_v10 = vld [vmem:[%s2342_s29 + $0xf8] sm:$0xff]  ;;  %v1025_v12 = vmul.f32 0.5, %v769_v2  ;;  %v264_v16 = vld [vmem:[%s2342_s29 + $0x100] sm:$0xff] }
  0x6b   : > { %v518_v5 = vld [vmem:[%s2350_s7 + $0xf0] sm:$0xff]  ;;  %v519_v11 = vld [vmem:[%s2350_s7 + $0xf8] sm:$0xff]  ;;  %1532 = vst [vmem:[%s2378_s21 + $0xa0] sm:$0xff] %v1276_v0  ;;  %1533 = vst [vmem:[%s2378_s21 + $0xa8] sm:$0xff] %v1277_v1  ;;  %v1026_v13 = vmul.f32 0.5, %v770_v3  ;;  %v772_v14 = vsub.f32 %v260_v56, %v516_v61  ;;  %v773_v15 = vsub.f32 %v261_v62, %v517_v63  ;;  %v1279_v19 = vadd.f32 %v1023_v7, %v511_v35 }
  0x6c   : > { %v520_v17 = vld [vmem:[%s2350_s7 + $0x100] sm:$0xff]  ;;  %v265_v18 = vld [vmem:[%s2342_s29 + $0x108] sm:$0xff]  ;;  %1534 = vst [vmem:[%s2378_s21 + $0xb0] sm:$0xff] %v1278_v6  ;;  %v1280_v20 = vadd.f32 %v1024_v8, %v512_v41  ;;  %v1027_v21 = vmul.f32 0.5, %v771_v9  ;;  %v774_v22 = vsub.f32 %v262_v4, %v518_v5  ;;  %v266_v24 = vld [vmem:[%s2342_s29 + $0x110] sm:$0xff]  ;;  %v1281_v26 = vadd.f32 %v1025_v12, %v513_v47 }
  0x6d   : > { %v521_v23 = vld [vmem:[%s2350_s7 + $0x108] sm:$0xff]  ;;  %v522_v25 = vld [vmem:[%s2350_s7 + $0x110] sm:$0xff]  ;;  %v1282_v27 = vadd.f32 %v1026_v13, %v514_v49  ;;  %v1028_v28 = vmul.f32 0.5, %v772_v14  ;;  %v1029_v29 = vmul.f32 0.5, %v773_v15  ;;  %v267_v30 = vld [vmem:[%s2342_s29 + $0x118] sm:$0xff]  ;;  %1535 = vst [vmem:[%s2378_s21 + $0xb8] sm:$0xff] %v1279_v19  ;;  %v775_v35 = vsub.f32 %v263_v10, %v519_v11 }
  0x6e   : > { %v523_v31 = vld [vmem:[%s2350_s7 + $0x118] sm:$0xff]  ;;  %v268_v32 = vld [vmem:[%s2342_s29 + $0x120] sm:$0xff]  ;;  %1536 = vst [vmem:[%s2378_s21 + $0xc0] sm:$0xff] %v1280_v20  ;;  %v1283_v33 = vadd.f32 %v1027_v21, %v515_v55  ;;  %v1030_v34 = vmul.f32 0.5, %v774_v22  ;;  %v776_v36 = vsub.f32 %v264_v16, %v520_v17  ;;  %v269_v38 = vld [vmem:[%s2342_s29 + $0x128] sm:$0xff]  ;;  %v777_v42 = vsub.f32 %v265_v18, %v521_v23 }
  0x6f   : > { %v524_v37 = vld [vmem:[%s2350_s7 + $0x120] sm:$0xff]  ;;  %v525_v39 = vld [vmem:[%s2350_s7 + $0x128] sm:$0xff]  ;;  %1537 = vst [vmem:[%s2378_s21 + $0xc8] sm:$0xff] %v1281_v26  ;;  %1538 = vst [vmem:[%s2378_s21 + $0xd0] sm:$0xff] %v1282_v27  ;;  %v1284_v40 = vadd.f32 %v1028_v28, %v516_v61  ;;  %v1285_v41 = vadd.f32 %v1029_v29, %v517_v63  ;;  %v778_v43 = vsub.f32 %v266_v24, %v522_v25  ;;  %v1031_v47 = vmul.f32 0.5, %v775_v35 }
  0x70   : > { %v270_v44 = vld [vmem:[%s2342_s29 + $0x130] sm:$0xff]  ;;  %1539 = vst [vmem:[%s2378_s21 + $0xd8] sm:$0xff] %v1283_v33  ;;  %v1286_v46 = vadd.f32 %v1030_v34, %v518_v5  ;;  %v1032_v48 = vmul.f32 0.5, %v776_v36  ;;  %v779_v49 = vsub.f32 %v267_v30, %v523_v31  ;;  %v271_v50 = vld [vmem:[%s2342_s29 + $0x138] sm:$0xff]  ;;  %v1033_v52 = vmul.f32 0.5, %v777_v42  ;;  %v272_v56 = vld [vmem:[%s2342_s29 + $0x140] sm:$0xff] }
  0x71   : > { %v526_v45 = vld [vmem:[%s2350_s7 + $0x130] sm:$0xff]  ;;  %v527_v51 = vld [vmem:[%s2350_s7 + $0x138] sm:$0xff]  ;;  %1540 = vst [vmem:[%s2378_s21 + $0xe0] sm:$0xff] %v1284_v40  ;;  %1541 = vst [vmem:[%s2378_s21 + $0xe8] sm:$0xff] %v1285_v41  ;;  %v1034_v53 = vmul.f32 0.5, %v778_v43  ;;  %v780_v54 = vsub.f32 %v268_v32, %v524_v37  ;;  %v781_v55 = vsub.f32 %v269_v38, %v525_v39  ;;  %v1287_v59 = vadd.f32 %v1031_v47, %v519_v11 }
  0x72   : > { %v528_v57 = vld [vmem:[%s2350_s7 + $0x140] sm:$0xff]  ;;  %v273_v58 = vld [vmem:[%s2342_s29 + $0x148] sm:$0xff]  ;;  %1542 = vst [vmem:[%s2378_s21 + $0xf0] sm:$0xff] %v1286_v46  ;;  %v1288_v60 = vadd.f32 %v1032_v48, %v520_v17  ;;  %v1035_v61 = vmul.f32 0.5, %v779_v49  ;;  %v782_v62 = vsub.f32 %v270_v44, %v526_v45  ;;  %v274_v0 = vld [vmem:[%s2342_s29 + $0x150] sm:$0xff]  ;;  %v1289_v2 = vadd.f32 %v1033_v52, %v521_v23 }
  0x73   : > { %v529_v63 = vld [vmem:[%s2350_s7 + $0x148] sm:$0xff]  ;;  %v530_v1 = vld [vmem:[%s2350_s7 + $0x150] sm:$0xff]  ;;  %v1290_v3 = vadd.f32 %v1034_v53, %v522_v25  ;;  %v1036_v4 = vmul.f32 0.5, %v780_v54  ;;  %v1037_v5 = vmul.f32 0.5, %v781_v55  ;;  %v275_v6 = vld [vmem:[%s2342_s29 + $0x158] sm:$0xff]  ;;  %1543 = vst [vmem:[%s2378_s21 + $0xf8] sm:$0xff] %v1287_v59  ;;  %v783_v11 = vsub.f32 %v271_v50, %v527_v51 }
  0x74   : > { %v531_v7 = vld [vmem:[%s2350_s7 + $0x158] sm:$0xff]  ;;  %v276_v8 = vld [vmem:[%s2342_s29 + $0x160] sm:$0xff]  ;;  %1544 = vst [vmem:[%s2378_s21 + $0x100] sm:$0xff] %v1288_v60  ;;  %v1291_v9 = vadd.f32 %v1035_v61, %v523_v31  ;;  %v1038_v10 = vmul.f32 0.5, %v782_v62  ;;  %v784_v12 = vsub.f32 %v272_v56, %v528_v57  ;;  %v277_v14 = vld [vmem:[%s2342_s29 + $0x168] sm:$0xff]  ;;  %v785_v18 = vsub.f32 %v273_v58, %v529_v63 }
  0x75   : > { %v532_v13 = vld [vmem:[%s2350_s7 + $0x160] sm:$0xff]  ;;  %v533_v15 = vld [vmem:[%s2350_s7 + $0x168] sm:$0xff]  ;;  %1545 = vst [vmem:[%s2378_s21 + $0x108] sm:$0xff] %v1289_v2  ;;  %1546 = vst [vmem:[%s2378_s21 + $0x110] sm:$0xff] %v1290_v3  ;;  %v1292_v16 = vadd.f32 %v1036_v4, %v524_v37  ;;  %v1293_v17 = vadd.f32 %v1037_v5, %v525_v39  ;;  %v786_v19 = vsub.f32 %v274_v0, %v530_v1  ;;  %v1039_v23 = vmul.f32 0.5, %v783_v11 }
  0x76   : > { %v278_v20 = vld [vmem:[%s2342_s29 + $0x170] sm:$0xff]  ;;  %1547 = vst [vmem:[%s2378_s21 + $0x118] sm:$0xff] %v1291_v9  ;;  %v1294_v22 = vadd.f32 %v1038_v10, %v526_v45  ;;  %v1040_v24 = vmul.f32 0.5, %v784_v12  ;;  %v787_v25 = vsub.f32 %v275_v6, %v531_v7  ;;  %v279_v26 = vld [vmem:[%s2342_s29 + $0x178] sm:$0xff]  ;;  %v1041_v28 = vmul.f32 0.5, %v785_v18  ;;  %v280_v32 = vld [vmem:[%s2342_s29 + $0x180] sm:$0xff] }
  0x77   : > { %v534_v21 = vld [vmem:[%s2350_s7 + $0x170] sm:$0xff]  ;;  %v535_v27 = vld [vmem:[%s2350_s7 + $0x178] sm:$0xff]  ;;  %1548 = vst [vmem:[%s2378_s21 + $0x120] sm:$0xff] %v1292_v16  ;;  %1549 = vst [vmem:[%s2378_s21 + $0x128] sm:$0xff] %v1293_v17  ;;  %v1042_v29 = vmul.f32 0.5, %v786_v19  ;;  %v788_v30 = vsub.f32 %v276_v8, %v532_v13  ;;  %v789_v31 = vsub.f32 %v277_v14, %v533_v15  ;;  %v1295_v35 = vadd.f32 %v1039_v23, %v527_v51 }
  0x78   : > { %v536_v33 = vld [vmem:[%s2350_s7 + $0x180] sm:$0xff]  ;;  %v281_v34 = vld [vmem:[%s2342_s29 + $0x188] sm:$0xff]  ;;  %1550 = vst [vmem:[%s2378_s21 + $0x130] sm:$0xff] %v1294_v22  ;;  %v1296_v36 = vadd.f32 %v1040_v24, %v528_v57  ;;  %v1043_v37 = vmul.f32 0.5, %v787_v25  ;;  %v790_v38 = vsub.f32 %v278_v20, %v534_v21  ;;  %v282_v40 = vld [vmem:[%s2342_s29 + $0x190] sm:$0xff]  ;;  %v1297_v42 = vadd.f32 %v1041_v28, %v529_v63 }
  0x79   : > { %v537_v39 = vld [vmem:[%s2350_s7 + $0x188] sm:$0xff]  ;;  %v538_v41 = vld [vmem:[%s2350_s7 + $0x190] sm:$0xff]  ;;  %v1298_v43 = vadd.f32 %v1042_v29, %v530_v1  ;;  %v1044_v44 = vmul.f32 0.5, %v788_v30  ;;  %v1045_v45 = vmul.f32 0.5, %v789_v31  ;;  %v283_v46 = vld [vmem:[%s2342_s29 + $0x198] sm:$0xff]  ;;  %1551 = vst [vmem:[%s2378_s21 + $0x138] sm:$0xff] %v1295_v35  ;;  %v791_v51 = vsub.f32 %v279_v26, %v535_v27 }
  0x7a   : > { %v539_v47 = vld [vmem:[%s2350_s7 + $0x198] sm:$0xff]  ;;  %v284_v48 = vld [vmem:[%s2342_s29 + $0x1a0] sm:$0xff]  ;;  %1552 = vst [vmem:[%s2378_s21 + $0x140] sm:$0xff] %v1296_v36  ;;  %v1299_v49 = vadd.f32 %v1043_v37, %v531_v7  ;;  %v1046_v50 = vmul.f32 0.5, %v790_v38  ;;  %v792_v52 = vsub.f32 %v280_v32, %v536_v33  ;;  %v285_v54 = vld [vmem:[%s2342_s29 + $0x1a8] sm:$0xff]  ;;  %v793_v58 = vsub.f32 %v281_v34, %v537_v39 }
  0x7b   : > { %v540_v53 = vld [vmem:[%s2350_s7 + $0x1a0] sm:$0xff]  ;;  %v541_v55 = vld [vmem:[%s2350_s7 + $0x1a8] sm:$0xff]  ;;  %1553 = vst [vmem:[%s2378_s21 + $0x148] sm:$0xff] %v1297_v42  ;;  %1554 = vst [vmem:[%s2378_s21 + $0x150] sm:$0xff] %v1298_v43  ;;  %v1300_v56 = vadd.f32 %v1044_v44, %v532_v13  ;;  %v1301_v57 = vadd.f32 %v1045_v45, %v533_v15  ;;  %v794_v59 = vsub.f32 %v282_v40, %v538_v41  ;;  %v1047_v63 = vmul.f32 0.5, %v791_v51 }
  0x7c   : > { %v286_v60 = vld [vmem:[%s2342_s29 + $0x1b0] sm:$0xff]  ;;  %1555 = vst [vmem:[%s2378_s21 + $0x158] sm:$0xff] %v1299_v49  ;;  %v1302_v62 = vadd.f32 %v1046_v50, %v534_v21  ;;  %v1048_v0 = vmul.f32 0.5, %v792_v52  ;;  %v795_v1 = vsub.f32 %v283_v46, %v539_v47  ;;  %v287_v2 = vld [vmem:[%s2342_s29 + $0x1b8] sm:$0xff]  ;;  %v1049_v4 = vmul.f32 0.5, %v793_v58  ;;  %v288_v8 = vld [vmem:[%s2342_s29 + $0x1c0] sm:$0xff] }
  0x7d   : > { %v542_v61 = vld [vmem:[%s2350_s7 + $0x1b0] sm:$0xff]  ;;  %v543_v3 = vld [vmem:[%s2350_s7 + $0x1b8] sm:$0xff]  ;;  %1556 = vst [vmem:[%s2378_s21 + $0x160] sm:$0xff] %v1300_v56  ;;  %1557 = vst [vmem:[%s2378_s21 + $0x168] sm:$0xff] %v1301_v57  ;;  %v1050_v5 = vmul.f32 0.5, %v794_v59  ;;  %v796_v6 = vsub.f32 %v284_v48, %v540_v53  ;;  %v797_v7 = vsub.f32 %v285_v54, %v541_v55  ;;  %v1303_v11 = vadd.f32 %v1047_v63, %v535_v27 }
  0x7e   : > { %v544_v9 = vld [vmem:[%s2350_s7 + $0x1c0] sm:$0xff]  ;;  %v289_v10 = vld [vmem:[%s2342_s29 + $0x1c8] sm:$0xff]  ;;  %1558 = vst [vmem:[%s2378_s21 + $0x170] sm:$0xff] %v1302_v62  ;;  %v1304_v12 = vadd.f32 %v1048_v0, %v536_v33  ;;  %v1051_v13 = vmul.f32 0.5, %v795_v1  ;;  %v798_v14 = vsub.f32 %v286_v60, %v542_v61  ;;  %v290_v16 = vld [vmem:[%s2342_s29 + $0x1d0] sm:$0xff]  ;;  %v1305_v18 = vadd.f32 %v1049_v4, %v537_v39 }
  0x7f   : > { %v545_v15 = vld [vmem:[%s2350_s7 + $0x1c8] sm:$0xff]  ;;  %v546_v17 = vld [vmem:[%s2350_s7 + $0x1d0] sm:$0xff]  ;;  %v1306_v19 = vadd.f32 %v1050_v5, %v538_v41  ;;  %v1052_v20 = vmul.f32 0.5, %v796_v6  ;;  %v1053_v21 = vmul.f32 0.5, %v797_v7  ;;  %v291_v22 = vld [vmem:[%s2342_s29 + $0x1d8] sm:$0xff]  ;;  %1559 = vst [vmem:[%s2378_s21 + $0x178] sm:$0xff] %v1303_v11  ;;  %v799_v27 = vsub.f32 %v287_v2, %v543_v3 }
  0x80   : > { %v547_v23 = vld [vmem:[%s2350_s7 + $0x1d8] sm:$0xff]  ;;  %v292_v24 = vld [vmem:[%s2342_s29 + $0x1e0] sm:$0xff]  ;;  %1560 = vst [vmem:[%s2378_s21 + $0x180] sm:$0xff] %v1304_v12  ;;  %v1307_v25 = vadd.f32 %v1051_v13, %v539_v47  ;;  %v1054_v26 = vmul.f32 0.5, %v798_v14  ;;  %v800_v28 = vsub.f32 %v288_v8, %v544_v9  ;;  %v293_v30 = vld [vmem:[%s2342_s29 + $0x1e8] sm:$0xff]  ;;  %v801_v34 = vsub.f32 %v289_v10, %v545_v15 }
  0x81   : > { %v548_v29 = vld [vmem:[%s2350_s7 + $0x1e0] sm:$0xff]  ;;  %v549_v31 = vld [vmem:[%s2350_s7 + $0x1e8] sm:$0xff]  ;;  %1561 = vst [vmem:[%s2378_s21 + $0x188] sm:$0xff] %v1305_v18  ;;  %1562 = vst [vmem:[%s2378_s21 + $0x190] sm:$0xff] %v1306_v19  ;;  %v1308_v32 = vadd.f32 %v1052_v20, %v540_v53  ;;  %v1309_v33 = vadd.f32 %v1053_v21, %v541_v55  ;;  %v802_v35 = vsub.f32 %v290_v16, %v546_v17  ;;  %v1055_v39 = vmul.f32 0.5, %v799_v27 }
  0x82   : > { %v294_v36 = vld [vmem:[%s2342_s29 + $0x1f0] sm:$0xff]  ;;  %1563 = vst [vmem:[%s2378_s21 + $0x198] sm:$0xff] %v1307_v25  ;;  %v1310_v38 = vadd.f32 %v1054_v26, %v542_v61  ;;  %v1056_v40 = vmul.f32 0.5, %v800_v28  ;;  %v803_v41 = vsub.f32 %v291_v22, %v547_v23  ;;  %v295_v42 = vld [vmem:[%s2342_s29 + $0x1f8] sm:$0xff]  ;;  %v1057_v44 = vmul.f32 0.5, %v801_v34  ;;  %v296_v48 = vld [vmem:[%s2342_s29 + $0x200] sm:$0xff] }
  0x83   : > { %v550_v37 = vld [vmem:[%s2350_s7 + $0x1f0] sm:$0xff]  ;;  %v551_v43 = vld [vmem:[%s2350_s7 + $0x1f8] sm:$0xff]  ;;  %1564 = vst [vmem:[%s2378_s21 + $0x1a0] sm:$0xff] %v1308_v32  ;;  %1565 = vst [vmem:[%s2378_s21 + $0x1a8] sm:$0xff] %v1309_v33  ;;  %v1058_v45 = vmul.f32 0.5, %v802_v35  ;;  %v804_v46 = vsub.f32 %v292_v24, %v548_v29  ;;  %v805_v47 = vsub.f32 %v293_v30, %v549_v31  ;;  %v1311_v51 = vadd.f32 %v1055_v39, %v543_v3 }
  0x84   : > { %v552_v49 = vld [vmem:[%s2350_s7 + $0x200] sm:$0xff]  ;;  %v297_v50 = vld [vmem:[%s2342_s29 + $0x208] sm:$0xff]  ;;  %1566 = vst [vmem:[%s2378_s21 + $0x1b0] sm:$0xff] %v1310_v38  ;;  %v1312_v52 = vadd.f32 %v1056_v40, %v544_v9  ;;  %v1059_v53 = vmul.f32 0.5, %v803_v41  ;;  %v806_v54 = vsub.f32 %v294_v36, %v550_v37  ;;  %v298_v56 = vld [vmem:[%s2342_s29 + $0x210] sm:$0xff]  ;;  %v1313_v58 = vadd.f32 %v1057_v44, %v545_v15 }
  0x85   : > { %v553_v55 = vld [vmem:[%s2350_s7 + $0x208] sm:$0xff]  ;;  %v554_v57 = vld [vmem:[%s2350_s7 + $0x210] sm:$0xff]  ;;  %v1314_v59 = vadd.f32 %v1058_v45, %v546_v17  ;;  %v1060_v60 = vmul.f32 0.5, %v804_v46  ;;  %v1061_v61 = vmul.f32 0.5, %v805_v47  ;;  %v299_v62 = vld [vmem:[%s2342_s29 + $0x218] sm:$0xff]  ;;  %1567 = vst [vmem:[%s2378_s21 + $0x1b8] sm:$0xff] %v1311_v51  ;;  %v807_v3 = vsub.f32 %v295_v42, %v551_v43 }
  0x86   : > { %v555_v63 = vld [vmem:[%s2350_s7 + $0x218] sm:$0xff]  ;;  %v300_v0 = vld [vmem:[%s2342_s29 + $0x220] sm:$0xff]  ;;  %1568 = vst [vmem:[%s2378_s21 + $0x1c0] sm:$0xff] %v1312_v52  ;;  %v1315_v1 = vadd.f32 %v1059_v53, %v547_v23  ;;  %v1062_v2 = vmul.f32 0.5, %v806_v54  ;;  %v808_v4 = vsub.f32 %v296_v48, %v552_v49  ;;  %v301_v6 = vld [vmem:[%s2342_s29 + $0x228] sm:$0xff]  ;;  %v809_v10 = vsub.f32 %v297_v50, %v553_v55 }
  0x87   : > { %v556_v5 = vld [vmem:[%s2350_s7 + $0x220] sm:$0xff]  ;;  %v557_v7 = vld [vmem:[%s2350_s7 + $0x228] sm:$0xff]  ;;  %1569 = vst [vmem:[%s2378_s21 + $0x1c8] sm:$0xff] %v1313_v58  ;;  %1570 = vst [vmem:[%s2378_s21 + $0x1d0] sm:$0xff] %v1314_v59  ;;  %v1316_v8 = vadd.f32 %v1060_v60, %v548_v29  ;;  %v1317_v9 = vadd.f32 %v1061_v61, %v549_v31  ;;  %v810_v11 = vsub.f32 %v298_v56, %v554_v57  ;;  %v1063_v15 = vmul.f32 0.5, %v807_v3 }
  0x88   : > { %v302_v12 = vld [vmem:[%s2342_s29 + $0x230] sm:$0xff]  ;;  %1571 = vst [vmem:[%s2378_s21 + $0x1d8] sm:$0xff] %v1315_v1  ;;  %v1318_v14 = vadd.f32 %v1062_v2, %v550_v37  ;;  %v1064_v16 = vmul.f32 0.5, %v808_v4  ;;  %v811_v17 = vsub.f32 %v299_v62, %v555_v63  ;;  %v303_v18 = vld [vmem:[%s2342_s29 + $0x238] sm:$0xff]  ;;  %v1065_v20 = vmul.f32 0.5, %v809_v10  ;;  %v304_v24 = vld [vmem:[%s2342_s29 + $0x240] sm:$0xff] }
  0x89   : > { %v558_v13 = vld [vmem:[%s2350_s7 + $0x230] sm:$0xff]  ;;  %v559_v19 = vld [vmem:[%s2350_s7 + $0x238] sm:$0xff]  ;;  %1572 = vst [vmem:[%s2378_s21 + $0x1e0] sm:$0xff] %v1316_v8  ;;  %1573 = vst [vmem:[%s2378_s21 + $0x1e8] sm:$0xff] %v1317_v9  ;;  %v1066_v21 = vmul.f32 0.5, %v810_v11  ;;  %v812_v22 = vsub.f32 %v300_v0, %v556_v5  ;;  %v813_v23 = vsub.f32 %v301_v6, %v557_v7  ;;  %v1319_v27 = vadd.f32 %v1063_v15, %v551_v43 }
  0x8a   : > { %v560_v25 = vld [vmem:[%s2350_s7 + $0x240] sm:$0xff]  ;;  %v305_v26 = vld [vmem:[%s2342_s29 + $0x248] sm:$0xff]  ;;  %1574 = vst [vmem:[%s2378_s21 + $0x1f0] sm:$0xff] %v1318_v14  ;;  %v1320_v28 = vadd.f32 %v1064_v16, %v552_v49  ;;  %v1067_v29 = vmul.f32 0.5, %v811_v17  ;;  %v814_v30 = vsub.f32 %v302_v12, %v558_v13  ;;  %v306_v32 = vld [vmem:[%s2342_s29 + $0x250] sm:$0xff]  ;;  %v1321_v34 = vadd.f32 %v1065_v20, %v553_v55 }
  0x8b   : > { %v561_v31 = vld [vmem:[%s2350_s7 + $0x248] sm:$0xff]  ;;  %v562_v33 = vld [vmem:[%s2350_s7 + $0x250] sm:$0xff]  ;;  %v1322_v35 = vadd.f32 %v1066_v21, %v554_v57  ;;  %v1068_v36 = vmul.f32 0.5, %v812_v22  ;;  %v1069_v37 = vmul.f32 0.5, %v813_v23  ;;  %v307_v38 = vld [vmem:[%s2342_s29 + $0x258] sm:$0xff]  ;;  %1575 = vst [vmem:[%s2378_s21 + $0x1f8] sm:$0xff] %v1319_v27  ;;  %v815_v43 = vsub.f32 %v303_v18, %v559_v19 }
  0x8c   : > { %v563_v39 = vld [vmem:[%s2350_s7 + $0x258] sm:$0xff]  ;;  %v308_v40 = vld [vmem:[%s2342_s29 + $0x260] sm:$0xff]  ;;  %1576 = vst [vmem:[%s2378_s21 + $0x200] sm:$0xff] %v1320_v28  ;;  %v1323_v41 = vadd.f32 %v1067_v29, %v555_v63  ;;  %v1070_v42 = vmul.f32 0.5, %v814_v30  ;;  %v816_v44 = vsub.f32 %v304_v24, %v560_v25  ;;  %v309_v46 = vld [vmem:[%s2342_s29 + $0x268] sm:$0xff]  ;;  %v817_v50 = vsub.f32 %v305_v26, %v561_v31 }
  0x8d   : > { %v564_v45 = vld [vmem:[%s2350_s7 + $0x260] sm:$0xff]  ;;  %v565_v47 = vld [vmem:[%s2350_s7 + $0x268] sm:$0xff]  ;;  %1577 = vst [vmem:[%s2378_s21 + $0x208] sm:$0xff] %v1321_v34  ;;  %1578 = vst [vmem:[%s2378_s21 + $0x210] sm:$0xff] %v1322_v35  ;;  %v1324_v48 = vadd.f32 %v1068_v36, %v556_v5  ;;  %v1325_v49 = vadd.f32 %v1069_v37, %v557_v7  ;;  %v818_v51 = vsub.f32 %v306_v32, %v562_v33  ;;  %v1071_v55 = vmul.f32 0.5, %v815_v43 }
  0x8e   : > { %v310_v52 = vld [vmem:[%s2342_s29 + $0x270] sm:$0xff]  ;;  %1579 = vst [vmem:[%s2378_s21 + $0x218] sm:$0xff] %v1323_v41  ;;  %v1326_v54 = vadd.f32 %v1070_v42, %v558_v13  ;;  %v1072_v56 = vmul.f32 0.5, %v816_v44  ;;  %v819_v57 = vsub.f32 %v307_v38, %v563_v39  ;;  %v311_v58 = vld [vmem:[%s2342_s29 + $0x278] sm:$0xff]  ;;  %v1073_v60 = vmul.f32 0.5, %v817_v50  ;;  %v312_v0 = vld [vmem:[%s2342_s29 + $0x280] sm:$0xff] }
  0x8f   : > { %v566_v53 = vld [vmem:[%s2350_s7 + $0x270] sm:$0xff]  ;;  %v567_v59 = vld [vmem:[%s2350_s7 + $0x278] sm:$0xff]  ;;  %1580 = vst [vmem:[%s2378_s21 + $0x220] sm:$0xff] %v1324_v48  ;;  %1581 = vst [vmem:[%s2378_s21 + $0x228] sm:$0xff] %v1325_v49  ;;  %v1074_v61 = vmul.f32 0.5, %v818_v51  ;;  %v820_v62 = vsub.f32 %v308_v40, %v564_v45  ;;  %v821_v63 = vsub.f32 %v309_v46, %v565_v47  ;;  %v1327_v3 = vadd.f32 %v1071_v55, %v559_v19 }
  0x90   : > { %v568_v1 = vld [vmem:[%s2350_s7 + $0x280] sm:$0xff]  ;;  %v313_v2 = vld [vmem:[%s2342_s29 + $0x288] sm:$0xff]  ;;  %1582 = vst [vmem:[%s2378_s21 + $0x230] sm:$0xff] %v1326_v54  ;;  %v1328_v4 = vadd.f32 %v1072_v56, %v560_v25  ;;  %v1075_v5 = vmul.f32 0.5, %v819_v57  ;;  %v822_v6 = vsub.f32 %v310_v52, %v566_v53  ;;  %v314_v8 = vld [vmem:[%s2342_s29 + $0x290] sm:$0xff]  ;;  %v1329_v10 = vadd.f32 %v1073_v60, %v561_v31 }
  0x91   : > { %v569_v7 = vld [vmem:[%s2350_s7 + $0x288] sm:$0xff]  ;;  %v570_v9 = vld [vmem:[%s2350_s7 + $0x290] sm:$0xff]  ;;  %v1330_v11 = vadd.f32 %v1074_v61, %v562_v33  ;;  %v1076_v12 = vmul.f32 0.5, %v820_v62  ;;  %v1077_v13 = vmul.f32 0.5, %v821_v63  ;;  %v315_v14 = vld [vmem:[%s2342_s29 + $0x298] sm:$0xff]  ;;  %1583 = vst [vmem:[%s2378_s21 + $0x238] sm:$0xff] %v1327_v3  ;;  %v823_v19 = vsub.f32 %v311_v58, %v567_v59 }
  0x92   : > { %v571_v15 = vld [vmem:[%s2350_s7 + $0x298] sm:$0xff]  ;;  %v316_v16 = vld [vmem:[%s2342_s29 + $0x2a0] sm:$0xff]  ;;  %1584 = vst [vmem:[%s2378_s21 + $0x240] sm:$0xff] %v1328_v4  ;;  %v1331_v17 = vadd.f32 %v1075_v5, %v563_v39  ;;  %v1078_v18 = vmul.f32 0.5, %v822_v6  ;;  %v824_v20 = vsub.f32 %v312_v0, %v568_v1  ;;  %v317_v22 = vld [vmem:[%s2342_s29 + $0x2a8] sm:$0xff]  ;;  %v825_v26 = vsub.f32 %v313_v2, %v569_v7 }
  0x93   : > { %v572_v21 = vld [vmem:[%s2350_s7 + $0x2a0] sm:$0xff]  ;;  %v573_v23 = vld [vmem:[%s2350_s7 + $0x2a8] sm:$0xff]  ;;  %1585 = vst [vmem:[%s2378_s21 + $0x248] sm:$0xff] %v1329_v10  ;;  %1586 = vst [vmem:[%s2378_s21 + $0x250] sm:$0xff] %v1330_v11  ;;  %v1332_v24 = vadd.f32 %v1076_v12, %v564_v45  ;;  %v1333_v25 = vadd.f32 %v1077_v13, %v565_v47  ;;  %v826_v27 = vsub.f32 %v314_v8, %v570_v9  ;;  %v1079_v31 = vmul.f32 0.5, %v823_v19 }
  0x94   : > { %v318_v28 = vld [vmem:[%s2342_s29 + $0x2b0] sm:$0xff]  ;;  %1587 = vst [vmem:[%s2378_s21 + $0x258] sm:$0xff] %v1331_v17  ;;  %v1334_v30 = vadd.f32 %v1078_v18, %v566_v53  ;;  %v1080_v32 = vmul.f32 0.5, %v824_v20  ;;  %v827_v33 = vsub.f32 %v315_v14, %v571_v15  ;;  %v319_v34 = vld [vmem:[%s2342_s29 + $0x2b8] sm:$0xff]  ;;  %v1081_v36 = vmul.f32 0.5, %v825_v26  ;;  %v320_v40 = vld [vmem:[%s2342_s29 + $0x2c0] sm:$0xff] }
  0x95   : > { %v574_v29 = vld [vmem:[%s2350_s7 + $0x2b0] sm:$0xff]  ;;  %v575_v35 = vld [vmem:[%s2350_s7 + $0x2b8] sm:$0xff]  ;;  %1588 = vst [vmem:[%s2378_s21 + $0x260] sm:$0xff] %v1332_v24  ;;  %1589 = vst [vmem:[%s2378_s21 + $0x268] sm:$0xff] %v1333_v25  ;;  %v1082_v37 = vmul.f32 0.5, %v826_v27  ;;  %v828_v38 = vsub.f32 %v316_v16, %v572_v21  ;;  %v829_v39 = vsub.f32 %v317_v22, %v573_v23  ;;  %v1335_v43 = vadd.f32 %v1079_v31, %v567_v59 }
  0x96   : > { %v576_v41 = vld [vmem:[%s2350_s7 + $0x2c0] sm:$0xff]  ;;  %v321_v42 = vld [vmem:[%s2342_s29 + $0x2c8] sm:$0xff]  ;;  %1590 = vst [vmem:[%s2378_s21 + $0x270] sm:$0xff] %v1334_v30  ;;  %v1336_v44 = vadd.f32 %v1080_v32, %v568_v1  ;;  %v1083_v45 = vmul.f32 0.5, %v827_v33  ;;  %v830_v46 = vsub.f32 %v318_v28, %v574_v29  ;;  %v322_v48 = vld [vmem:[%s2342_s29 + $0x2d0] sm:$0xff]  ;;  %v1337_v50 = vadd.f32 %v1081_v36, %v569_v7 }
  0x97   : > { %v577_v47 = vld [vmem:[%s2350_s7 + $0x2c8] sm:$0xff]  ;;  %v578_v49 = vld [vmem:[%s2350_s7 + $0x2d0] sm:$0xff]  ;;  %v1338_v51 = vadd.f32 %v1082_v37, %v570_v9  ;;  %v1084_v52 = vmul.f32 0.5, %v828_v38  ;;  %v1085_v53 = vmul.f32 0.5, %v829_v39  ;;  %v323_v54 = vld [vmem:[%s2342_s29 + $0x2d8] sm:$0xff]  ;;  %1591 = vst [vmem:[%s2378_s21 + $0x278] sm:$0xff] %v1335_v43  ;;  %v831_v59 = vsub.f32 %v319_v34, %v575_v35 }
  0x98   : > { %v579_v55 = vld [vmem:[%s2350_s7 + $0x2d8] sm:$0xff]  ;;  %v324_v56 = vld [vmem:[%s2342_s29 + $0x2e0] sm:$0xff]  ;;  %1592 = vst [vmem:[%s2378_s21 + $0x280] sm:$0xff] %v1336_v44  ;;  %v1339_v57 = vadd.f32 %v1083_v45, %v571_v15  ;;  %v1086_v58 = vmul.f32 0.5, %v830_v46  ;;  %v832_v60 = vsub.f32 %v320_v40, %v576_v41  ;;  %v325_v62 = vld [vmem:[%s2342_s29 + $0x2e8] sm:$0xff]  ;;  %v833_v2 = vsub.f32 %v321_v42, %v577_v47 }
  0x99   : > { %v580_v61 = vld [vmem:[%s2350_s7 + $0x2e0] sm:$0xff]  ;;  %v581_v63 = vld [vmem:[%s2350_s7 + $0x2e8] sm:$0xff]  ;;  %1593 = vst [vmem:[%s2378_s21 + $0x288] sm:$0xff] %v1337_v50  ;;  %1594 = vst [vmem:[%s2378_s21 + $0x290] sm:$0xff] %v1338_v51  ;;  %v1340_v0 = vadd.f32 %v1084_v52, %v572_v21  ;;  %v1341_v1 = vadd.f32 %v1085_v53, %v573_v23  ;;  %v834_v3 = vsub.f32 %v322_v48, %v578_v49  ;;  %v1087_v7 = vmul.f32 0.5, %v831_v59 }
  0x9a   : > { %v326_v4 = vld [vmem:[%s2342_s29 + $0x2f0] sm:$0xff]  ;;  %1595 = vst [vmem:[%s2378_s21 + $0x298] sm:$0xff] %v1339_v57  ;;  %v1342_v6 = vadd.f32 %v1086_v58, %v574_v29  ;;  %v1088_v8 = vmul.f32 0.5, %v832_v60  ;;  %v835_v9 = vsub.f32 %v323_v54, %v579_v55  ;;  %v327_v10 = vld [vmem:[%s2342_s29 + $0x2f8] sm:$0xff]  ;;  %v1089_v12 = vmul.f32 0.5, %v833_v2  ;;  %v328_v16 = vld [vmem:[%s2342_s29 + $0x300] sm:$0xff] }
  0x9b   : > { %v582_v5 = vld [vmem:[%s2350_s7 + $0x2f0] sm:$0xff]  ;;  %v583_v11 = vld [vmem:[%s2350_s7 + $0x2f8] sm:$0xff]  ;;  %1596 = vst [vmem:[%s2378_s21 + $0x2a0] sm:$0xff] %v1340_v0  ;;  %1597 = vst [vmem:[%s2378_s21 + $0x2a8] sm:$0xff] %v1341_v1  ;;  %v1090_v13 = vmul.f32 0.5, %v834_v3  ;;  %v836_v14 = vsub.f32 %v324_v56, %v580_v61  ;;  %v837_v15 = vsub.f32 %v325_v62, %v581_v63  ;;  %v1343_v19 = vadd.f32 %v1087_v7, %v575_v35 }
  0x9c   : > { %v584_v17 = vld [vmem:[%s2350_s7 + $0x300] sm:$0xff]  ;;  %v329_v18 = vld [vmem:[%s2342_s29 + $0x308] sm:$0xff]  ;;  %1598 = vst [vmem:[%s2378_s21 + $0x2b0] sm:$0xff] %v1342_v6  ;;  %v1344_v20 = vadd.f32 %v1088_v8, %v576_v41  ;;  %v1091_v21 = vmul.f32 0.5, %v835_v9  ;;  %v838_v22 = vsub.f32 %v326_v4, %v582_v5  ;;  %v330_v24 = vld [vmem:[%s2342_s29 + $0x310] sm:$0xff]  ;;  %v1345_v26 = vadd.f32 %v1089_v12, %v577_v47 }
  0x9d   : > { %v585_v23 = vld [vmem:[%s2350_s7 + $0x308] sm:$0xff]  ;;  %v586_v25 = vld [vmem:[%s2350_s7 + $0x310] sm:$0xff]  ;;  %v1346_v27 = vadd.f32 %v1090_v13, %v578_v49  ;;  %v1092_v28 = vmul.f32 0.5, %v836_v14  ;;  %v1093_v29 = vmul.f32 0.5, %v837_v15  ;;  %v331_v30 = vld [vmem:[%s2342_s29 + $0x318] sm:$0xff]  ;;  %1599 = vst [vmem:[%s2378_s21 + $0x2b8] sm:$0xff] %v1343_v19  ;;  %v839_v35 = vsub.f32 %v327_v10, %v583_v11 }
  0x9e   : > { %v587_v31 = vld [vmem:[%s2350_s7 + $0x318] sm:$0xff]  ;;  %v332_v32 = vld [vmem:[%s2342_s29 + $0x320] sm:$0xff]  ;;  %1600 = vst [vmem:[%s2378_s21 + $0x2c0] sm:$0xff] %v1344_v20  ;;  %v1347_v33 = vadd.f32 %v1091_v21, %v579_v55  ;;  %v1094_v34 = vmul.f32 0.5, %v838_v22  ;;  %v840_v36 = vsub.f32 %v328_v16, %v584_v17  ;;  %v333_v38 = vld [vmem:[%s2342_s29 + $0x328] sm:$0xff]  ;;  %v841_v42 = vsub.f32 %v329_v18, %v585_v23 }
  0x9f   : > { %v588_v37 = vld [vmem:[%s2350_s7 + $0x320] sm:$0xff]  ;;  %v589_v39 = vld [vmem:[%s2350_s7 + $0x328] sm:$0xff]  ;;  %1601 = vst [vmem:[%s2378_s21 + $0x2c8] sm:$0xff] %v1345_v26  ;;  %1602 = vst [vmem:[%s2378_s21 + $0x2d0] sm:$0xff] %v1346_v27  ;;  %v1348_v40 = vadd.f32 %v1092_v28, %v580_v61  ;;  %v1349_v41 = vadd.f32 %v1093_v29, %v581_v63  ;;  %v842_v43 = vsub.f32 %v330_v24, %v586_v25  ;;  %v1095_v47 = vmul.f32 0.5, %v839_v35 }
  0xa0   : > { %v334_v44 = vld [vmem:[%s2342_s29 + $0x330] sm:$0xff]  ;;  %1603 = vst [vmem:[%s2378_s21 + $0x2d8] sm:$0xff] %v1347_v33  ;;  %v1350_v46 = vadd.f32 %v1094_v34, %v582_v5  ;;  %v1096_v48 = vmul.f32 0.5, %v840_v36  ;;  %v843_v49 = vsub.f32 %v331_v30, %v587_v31  ;;  %v335_v50 = vld [vmem:[%s2342_s29 + $0x338] sm:$0xff]  ;;  %v1097_v52 = vmul.f32 0.5, %v841_v42  ;;  %v336_v56 = vld [vmem:[%s2342_s29 + $0x340] sm:$0xff] }
  0xa1   : > { %v590_v45 = vld [vmem:[%s2350_s7 + $0x330] sm:$0xff]  ;;  %v591_v51 = vld [vmem:[%s2350_s7 + $0x338] sm:$0xff]  ;;  %1604 = vst [vmem:[%s2378_s21 + $0x2e0] sm:$0xff] %v1348_v40  ;;  %1605 = vst [vmem:[%s2378_s21 + $0x2e8] sm:$0xff] %v1349_v41  ;;  %v1098_v53 = vmul.f32 0.5, %v842_v43  ;;  %v844_v54 = vsub.f32 %v332_v32, %v588_v37  ;;  %v845_v55 = vsub.f32 %v333_v38, %v589_v39  ;;  %v1351_v59 = vadd.f32 %v1095_v47, %v583_v11 }
  0xa2   : > { %v592_v57 = vld [vmem:[%s2350_s7 + $0x340] sm:$0xff]  ;;  %v337_v58 = vld [vmem:[%s2342_s29 + $0x348] sm:$0xff]  ;;  %1606 = vst [vmem:[%s2378_s21 + $0x2f0] sm:$0xff] %v1350_v46  ;;  %v1352_v60 = vadd.f32 %v1096_v48, %v584_v17  ;;  %v1099_v61 = vmul.f32 0.5, %v843_v49  ;;  %v846_v62 = vsub.f32 %v334_v44, %v590_v45  ;;  %v338_v0 = vld [vmem:[%s2342_s29 + $0x350] sm:$0xff]  ;;  %v1353_v2 = vadd.f32 %v1097_v52, %v585_v23 }
  0xa3   : > { %v593_v63 = vld [vmem:[%s2350_s7 + $0x348] sm:$0xff]  ;;  %v594_v1 = vld [vmem:[%s2350_s7 + $0x350] sm:$0xff]  ;;  %v1354_v3 = vadd.f32 %v1098_v53, %v586_v25  ;;  %v1100_v4 = vmul.f32 0.5, %v844_v54  ;;  %v1101_v5 = vmul.f32 0.5, %v845_v55  ;;  %v339_v6 = vld [vmem:[%s2342_s29 + $0x358] sm:$0xff]  ;;  %1607 = vst [vmem:[%s2378_s21 + $0x2f8] sm:$0xff] %v1351_v59  ;;  %v847_v11 = vsub.f32 %v335_v50, %v591_v51 }
  0xa4   : > { %v595_v7 = vld [vmem:[%s2350_s7 + $0x358] sm:$0xff]  ;;  %v340_v8 = vld [vmem:[%s2342_s29 + $0x360] sm:$0xff]  ;;  %1608 = vst [vmem:[%s2378_s21 + $0x300] sm:$0xff] %v1352_v60  ;;  %v1355_v9 = vadd.f32 %v1099_v61, %v587_v31  ;;  %v1102_v10 = vmul.f32 0.5, %v846_v62  ;;  %v848_v12 = vsub.f32 %v336_v56, %v592_v57  ;;  %v341_v14 = vld [vmem:[%s2342_s29 + $0x368] sm:$0xff]  ;;  %v849_v18 = vsub.f32 %v337_v58, %v593_v63 }
  0xa5   : > { %v596_v13 = vld [vmem:[%s2350_s7 + $0x360] sm:$0xff]  ;;  %v597_v15 = vld [vmem:[%s2350_s7 + $0x368] sm:$0xff]  ;;  %1609 = vst [vmem:[%s2378_s21 + $0x308] sm:$0xff] %v1353_v2  ;;  %1610 = vst [vmem:[%s2378_s21 + $0x310] sm:$0xff] %v1354_v3  ;;  %v1356_v16 = vadd.f32 %v1100_v4, %v588_v37  ;;  %v1357_v17 = vadd.f32 %v1101_v5, %v589_v39  ;;  %v850_v19 = vsub.f32 %v338_v0, %v594_v1  ;;  %v1103_v23 = vmul.f32 0.5, %v847_v11 }
  0xa6   : > { %v342_v20 = vld [vmem:[%s2342_s29 + $0x370] sm:$0xff]  ;;  %1611 = vst [vmem:[%s2378_s21 + $0x318] sm:$0xff] %v1355_v9  ;;  %v1358_v22 = vadd.f32 %v1102_v10, %v590_v45  ;;  %v1104_v24 = vmul.f32 0.5, %v848_v12  ;;  %v851_v25 = vsub.f32 %v339_v6, %v595_v7  ;;  %v343_v26 = vld [vmem:[%s2342_s29 + $0x378] sm:$0xff]  ;;  %v1105_v28 = vmul.f32 0.5, %v849_v18  ;;  %v344_v32 = vld [vmem:[%s2342_s29 + $0x380] sm:$0xff] }
  0xa7   : > { %v598_v21 = vld [vmem:[%s2350_s7 + $0x370] sm:$0xff]  ;;  %v599_v27 = vld [vmem:[%s2350_s7 + $0x378] sm:$0xff]  ;;  %1612 = vst [vmem:[%s2378_s21 + $0x320] sm:$0xff] %v1356_v16  ;;  %1613 = vst [vmem:[%s2378_s21 + $0x328] sm:$0xff] %v1357_v17  ;;  %v1106_v29 = vmul.f32 0.5, %v850_v19  ;;  %v852_v30 = vsub.f32 %v340_v8, %v596_v13  ;;  %v853_v31 = vsub.f32 %v341_v14, %v597_v15  ;;  %v1359_v35 = vadd.f32 %v1103_v23, %v591_v51 }
  0xa8   : > { %v600_v33 = vld [vmem:[%s2350_s7 + $0x380] sm:$0xff]  ;;  %v345_v34 = vld [vmem:[%s2342_s29 + $0x388] sm:$0xff]  ;;  %1614 = vst [vmem:[%s2378_s21 + $0x330] sm:$0xff] %v1358_v22  ;;  %v1360_v36 = vadd.f32 %v1104_v24, %v592_v57  ;;  %v1107_v37 = vmul.f32 0.5, %v851_v25  ;;  %v854_v38 = vsub.f32 %v342_v20, %v598_v21  ;;  %v346_v40 = vld [vmem:[%s2342_s29 + $0x390] sm:$0xff]  ;;  %v1361_v42 = vadd.f32 %v1105_v28, %v593_v63 }
  0xa9   : > { %v601_v39 = vld [vmem:[%s2350_s7 + $0x388] sm:$0xff]  ;;  %v602_v41 = vld [vmem:[%s2350_s7 + $0x390] sm:$0xff]  ;;  %v1362_v43 = vadd.f32 %v1106_v29, %v594_v1  ;;  %v1108_v44 = vmul.f32 0.5, %v852_v30  ;;  %v1109_v45 = vmul.f32 0.5, %v853_v31  ;;  %v347_v46 = vld [vmem:[%s2342_s29 + $0x398] sm:$0xff]  ;;  %1615 = vst [vmem:[%s2378_s21 + $0x338] sm:$0xff] %v1359_v35  ;;  %v855_v51 = vsub.f32 %v343_v26, %v599_v27 }
  0xaa   : > { %v603_v47 = vld [vmem:[%s2350_s7 + $0x398] sm:$0xff]  ;;  %v348_v48 = vld [vmem:[%s2342_s29 + $0x3a0] sm:$0xff]  ;;  %1616 = vst [vmem:[%s2378_s21 + $0x340] sm:$0xff] %v1360_v36  ;;  %v1363_v49 = vadd.f32 %v1107_v37, %v595_v7  ;;  %v1110_v50 = vmul.f32 0.5, %v854_v38  ;;  %v856_v52 = vsub.f32 %v344_v32, %v600_v33  ;;  %v349_v54 = vld [vmem:[%s2342_s29 + $0x3a8] sm:$0xff]  ;;  %v857_v58 = vsub.f32 %v345_v34, %v601_v39 }
  0xab   : > { %v604_v53 = vld [vmem:[%s2350_s7 + $0x3a0] sm:$0xff]  ;;  %v605_v55 = vld [vmem:[%s2350_s7 + $0x3a8] sm:$0xff]  ;;  %1617 = vst [vmem:[%s2378_s21 + $0x348] sm:$0xff] %v1361_v42  ;;  %1618 = vst [vmem:[%s2378_s21 + $0x350] sm:$0xff] %v1362_v43  ;;  %v1364_v56 = vadd.f32 %v1108_v44, %v596_v13  ;;  %v1365_v57 = vadd.f32 %v1109_v45, %v597_v15  ;;  %v858_v59 = vsub.f32 %v346_v40, %v602_v41  ;;  %v1111_v63 = vmul.f32 0.5, %v855_v51 }
  0xac   : > { %v350_v60 = vld [vmem:[%s2342_s29 + $0x3b0] sm:$0xff]  ;;  %1619 = vst [vmem:[%s2378_s21 + $0x358] sm:$0xff] %v1363_v49  ;;  %v1366_v62 = vadd.f32 %v1110_v50, %v598_v21  ;;  %v1112_v0 = vmul.f32 0.5, %v856_v52  ;;  %v859_v1 = vsub.f32 %v347_v46, %v603_v47  ;;  %v351_v2 = vld [vmem:[%s2342_s29 + $0x3b8] sm:$0xff]  ;;  %v1113_v4 = vmul.f32 0.5, %v857_v58  ;;  %v352_v8 = vld [vmem:[%s2342_s29 + $0x3c0] sm:$0xff] }
  0xad   : > { %v606_v61 = vld [vmem:[%s2350_s7 + $0x3b0] sm:$0xff]  ;;  %v607_v3 = vld [vmem:[%s2350_s7 + $0x3b8] sm:$0xff]  ;;  %1620 = vst [vmem:[%s2378_s21 + $0x360] sm:$0xff] %v1364_v56  ;;  %1621 = vst [vmem:[%s2378_s21 + $0x368] sm:$0xff] %v1365_v57  ;;  %v1114_v5 = vmul.f32 0.5, %v858_v59  ;;  %v860_v6 = vsub.f32 %v348_v48, %v604_v53  ;;  %v861_v7 = vsub.f32 %v349_v54, %v605_v55  ;;  %v1367_v11 = vadd.f32 %v1111_v63, %v599_v27 }
  0xae   : > { %v608_v9 = vld [vmem:[%s2350_s7 + $0x3c0] sm:$0xff]  ;;  %v353_v10 = vld [vmem:[%s2342_s29 + $0x3c8] sm:$0xff]  ;;  %1622 = vst [vmem:[%s2378_s21 + $0x370] sm:$0xff] %v1366_v62  ;;  %v1368_v12 = vadd.f32 %v1112_v0, %v600_v33  ;;  %v1115_v13 = vmul.f32 0.5, %v859_v1  ;;  %v862_v14 = vsub.f32 %v350_v60, %v606_v61  ;;  %v354_v16 = vld [vmem:[%s2342_s29 + $0x3d0] sm:$0xff]  ;;  %v1369_v18 = vadd.f32 %v1113_v4, %v601_v39 }
  0xaf   : > { %v609_v15 = vld [vmem:[%s2350_s7 + $0x3c8] sm:$0xff]  ;;  %v610_v17 = vld [vmem:[%s2350_s7 + $0x3d0] sm:$0xff]  ;;  %v1370_v19 = vadd.f32 %v1114_v5, %v602_v41  ;;  %v1116_v20 = vmul.f32 0.5, %v860_v6  ;;  %v1117_v21 = vmul.f32 0.5, %v861_v7  ;;  %v355_v22 = vld [vmem:[%s2342_s29 + $0x3d8] sm:$0xff]  ;;  %1623 = vst [vmem:[%s2378_s21 + $0x378] sm:$0xff] %v1367_v11  ;;  %v863_v27 = vsub.f32 %v351_v2, %v607_v3 }
  0xb0   : > { %v611_v23 = vld [vmem:[%s2350_s7 + $0x3d8] sm:$0xff]  ;;  %v356_v24 = vld [vmem:[%s2342_s29 + $0x3e0] sm:$0xff]  ;;  %1624 = vst [vmem:[%s2378_s21 + $0x380] sm:$0xff] %v1368_v12  ;;  %v1371_v25 = vadd.f32 %v1115_v13, %v603_v47  ;;  %v1118_v26 = vmul.f32 0.5, %v862_v14  ;;  %v864_v28 = vsub.f32 %v352_v8, %v608_v9  ;;  %v357_v30 = vld [vmem:[%s2342_s29 + $0x3e8] sm:$0xff]  ;;  %v865_v34 = vsub.f32 %v353_v10, %v609_v15 }
  0xb1   : > { %v612_v29 = vld [vmem:[%s2350_s7 + $0x3e0] sm:$0xff]  ;;  %v613_v31 = vld [vmem:[%s2350_s7 + $0x3e8] sm:$0xff]  ;;  %1625 = vst [vmem:[%s2378_s21 + $0x388] sm:$0xff] %v1369_v18  ;;  %1626 = vst [vmem:[%s2378_s21 + $0x390] sm:$0xff] %v1370_v19  ;;  %v1372_v32 = vadd.f32 %v1116_v20, %v604_v53  ;;  %v1373_v33 = vadd.f32 %v1117_v21, %v605_v55  ;;  %v866_v35 = vsub.f32 %v354_v16, %v610_v17  ;;  %v1119_v39 = vmul.f32 0.5, %v863_v27 }
  0xb2   : > { %v358_v36 = vld [vmem:[%s2342_s29 + $0x3f0] sm:$0xff]  ;;  %1627 = vst [vmem:[%s2378_s21 + $0x398] sm:$0xff] %v1371_v25  ;;  %v1374_v38 = vadd.f32 %v1118_v26, %v606_v61  ;;  %v1120_v40 = vmul.f32 0.5, %v864_v28  ;;  %v867_v41 = vsub.f32 %v355_v22, %v611_v23  ;;  %v359_v42 = vld [vmem:[%s2342_s29 + $0x3f8] sm:$0xff]  ;;  %v1121_v44 = vmul.f32 0.5, %v865_v34  ;;  %v360_v48 = vld [vmem:[%s2342_s29 + $0x400] sm:$0xff] }
  0xb3   : > { %v614_v37 = vld [vmem:[%s2350_s7 + $0x3f0] sm:$0xff]  ;;  %v615_v43 = vld [vmem:[%s2350_s7 + $0x3f8] sm:$0xff]  ;;  %1628 = vst [vmem:[%s2378_s21 + $0x3a0] sm:$0xff] %v1372_v32  ;;  %1629 = vst [vmem:[%s2378_s21 + $0x3a8] sm:$0xff] %v1373_v33  ;;  %v1122_v45 = vmul.f32 0.5, %v866_v35  ;;  %v868_v46 = vsub.f32 %v356_v24, %v612_v29  ;;  %v869_v47 = vsub.f32 %v357_v30, %v613_v31  ;;  %v1375_v51 = vadd.f32 %v1119_v39, %v607_v3 }
  0xb4   : > { %v616_v49 = vld [vmem:[%s2350_s7 + $0x400] sm:$0xff]  ;;  %v361_v50 = vld [vmem:[%s2342_s29 + $0x408] sm:$0xff]  ;;  %1630 = vst [vmem:[%s2378_s21 + $0x3b0] sm:$0xff] %v1374_v38  ;;  %v1376_v52 = vadd.f32 %v1120_v40, %v608_v9  ;;  %v1123_v53 = vmul.f32 0.5, %v867_v41  ;;  %v870_v54 = vsub.f32 %v358_v36, %v614_v37  ;;  %v362_v56 = vld [vmem:[%s2342_s29 + $0x410] sm:$0xff]  ;;  %v1377_v58 = vadd.f32 %v1121_v44, %v609_v15 }
  0xb5   : > { %v617_v55 = vld [vmem:[%s2350_s7 + $0x408] sm:$0xff]  ;;  %v618_v57 = vld [vmem:[%s2350_s7 + $0x410] sm:$0xff]  ;;  %v1378_v59 = vadd.f32 %v1122_v45, %v610_v17  ;;  %v1124_v60 = vmul.f32 0.5, %v868_v46  ;;  %v1125_v61 = vmul.f32 0.5, %v869_v47  ;;  %v363_v62 = vld [vmem:[%s2342_s29 + $0x418] sm:$0xff]  ;;  %1631 = vst [vmem:[%s2378_s21 + $0x3b8] sm:$0xff] %v1375_v51  ;;  %v871_v3 = vsub.f32 %v359_v42, %v615_v43 }
  0xb6   : > { %v619_v63 = vld [vmem:[%s2350_s7 + $0x418] sm:$0xff]  ;;  %v364_v0 = vld [vmem:[%s2342_s29 + $0x420] sm:$0xff]  ;;  %1632 = vst [vmem:[%s2378_s21 + $0x3c0] sm:$0xff] %v1376_v52  ;;  %v1379_v1 = vadd.f32 %v1123_v53, %v611_v23  ;;  %v1126_v2 = vmul.f32 0.5, %v870_v54  ;;  %v872_v4 = vsub.f32 %v360_v48, %v616_v49  ;;  %v365_v6 = vld [vmem:[%s2342_s29 + $0x428] sm:$0xff]  ;;  %v873_v10 = vsub.f32 %v361_v50, %v617_v55 }
  0xb7   : > { %v620_v5 = vld [vmem:[%s2350_s7 + $0x420] sm:$0xff]  ;;  %v621_v7 = vld [vmem:[%s2350_s7 + $0x428] sm:$0xff]  ;;  %1633 = vst [vmem:[%s2378_s21 + $0x3c8] sm:$0xff] %v1377_v58  ;;  %1634 = vst [vmem:[%s2378_s21 + $0x3d0] sm:$0xff] %v1378_v59  ;;  %v1380_v8 = vadd.f32 %v1124_v60, %v612_v29  ;;  %v1381_v9 = vadd.f32 %v1125_v61, %v613_v31  ;;  %v874_v11 = vsub.f32 %v362_v56, %v618_v57  ;;  %v1127_v15 = vmul.f32 0.5, %v871_v3 }
  0xb8   : > { %v366_v12 = vld [vmem:[%s2342_s29 + $0x430] sm:$0xff]  ;;  %1635 = vst [vmem:[%s2378_s21 + $0x3d8] sm:$0xff] %v1379_v1  ;;  %v1382_v14 = vadd.f32 %v1126_v2, %v614_v37  ;;  %v1128_v16 = vmul.f32 0.5, %v872_v4  ;;  %v875_v17 = vsub.f32 %v363_v62, %v619_v63  ;;  %v367_v18 = vld [vmem:[%s2342_s29 + $0x438] sm:$0xff]  ;;  %v1129_v20 = vmul.f32 0.5, %v873_v10  ;;  %v368_v24 = vld [vmem:[%s2342_s29 + $0x440] sm:$0xff] }
  0xb9   : > { %v622_v13 = vld [vmem:[%s2350_s7 + $0x430] sm:$0xff]  ;;  %v623_v19 = vld [vmem:[%s2350_s7 + $0x438] sm:$0xff]  ;;  %1636 = vst [vmem:[%s2378_s21 + $0x3e0] sm:$0xff] %v1380_v8  ;;  %1637 = vst [vmem:[%s2378_s21 + $0x3e8] sm:$0xff] %v1381_v9  ;;  %v1130_v21 = vmul.f32 0.5, %v874_v11  ;;  %v876_v22 = vsub.f32 %v364_v0, %v620_v5  ;;  %v877_v23 = vsub.f32 %v365_v6, %v621_v7  ;;  %v1383_v27 = vadd.f32 %v1127_v15, %v615_v43 }
  0xba   : > { %v624_v25 = vld [vmem:[%s2350_s7 + $0x440] sm:$0xff]  ;;  %v369_v26 = vld [vmem:[%s2342_s29 + $0x448] sm:$0xff]  ;;  %1638 = vst [vmem:[%s2378_s21 + $0x3f0] sm:$0xff] %v1382_v14  ;;  %v1384_v28 = vadd.f32 %v1128_v16, %v616_v49  ;;  %v1131_v29 = vmul.f32 0.5, %v875_v17  ;;  %v878_v30 = vsub.f32 %v366_v12, %v622_v13  ;;  %v370_v32 = vld [vmem:[%s2342_s29 + $0x450] sm:$0xff]  ;;  %v1385_v34 = vadd.f32 %v1129_v20, %v617_v55 }
  0xbb   : > { %v625_v31 = vld [vmem:[%s2350_s7 + $0x448] sm:$0xff]  ;;  %v626_v33 = vld [vmem:[%s2350_s7 + $0x450] sm:$0xff]  ;;  %v1386_v35 = vadd.f32 %v1130_v21, %v618_v57  ;;  %v1132_v36 = vmul.f32 0.5, %v876_v22  ;;  %v1133_v37 = vmul.f32 0.5, %v877_v23  ;;  %v371_v38 = vld [vmem:[%s2342_s29 + $0x458] sm:$0xff]  ;;  %1639 = vst [vmem:[%s2378_s21 + $0x3f8] sm:$0xff] %v1383_v27  ;;  %v879_v43 = vsub.f32 %v367_v18, %v623_v19 }
  0xbc   : > { %v627_v39 = vld [vmem:[%s2350_s7 + $0x458] sm:$0xff]  ;;  %v372_v40 = vld [vmem:[%s2342_s29 + $0x460] sm:$0xff]  ;;  %1640 = vst [vmem:[%s2378_s21 + $0x400] sm:$0xff] %v1384_v28  ;;  %v1387_v41 = vadd.f32 %v1131_v29, %v619_v63  ;;  %v1134_v42 = vmul.f32 0.5, %v878_v30  ;;  %v880_v44 = vsub.f32 %v368_v24, %v624_v25  ;;  %v373_v46 = vld [vmem:[%s2342_s29 + $0x468] sm:$0xff]  ;;  %v881_v50 = vsub.f32 %v369_v26, %v625_v31 }
  0xbd   : > { %v628_v45 = vld [vmem:[%s2350_s7 + $0x460] sm:$0xff]  ;;  %v629_v47 = vld [vmem:[%s2350_s7 + $0x468] sm:$0xff]  ;;  %1641 = vst [vmem:[%s2378_s21 + $0x408] sm:$0xff] %v1385_v34  ;;  %1642 = vst [vmem:[%s2378_s21 + $0x410] sm:$0xff] %v1386_v35  ;;  %v1388_v48 = vadd.f32 %v1132_v36, %v620_v5  ;;  %v1389_v49 = vadd.f32 %v1133_v37, %v621_v7  ;;  %v882_v51 = vsub.f32 %v370_v32, %v626_v33  ;;  %v1135_v55 = vmul.f32 0.5, %v879_v43 }
  0xbe   : > { %v374_v52 = vld [vmem:[%s2342_s29 + $0x470] sm:$0xff]  ;;  %1643 = vst [vmem:[%s2378_s21 + $0x418] sm:$0xff] %v1387_v41  ;;  %v1390_v54 = vadd.f32 %v1134_v42, %v622_v13  ;;  %v1136_v56 = vmul.f32 0.5, %v880_v44  ;;  %v883_v57 = vsub.f32 %v371_v38, %v627_v39  ;;  %v375_v58 = vld [vmem:[%s2342_s29 + $0x478] sm:$0xff]  ;;  %v1137_v60 = vmul.f32 0.5, %v881_v50  ;;  %v376_v0 = vld [vmem:[%s2342_s29 + $0x480] sm:$0xff] }
  0xbf   : > { %v630_v53 = vld [vmem:[%s2350_s7 + $0x470] sm:$0xff]  ;;  %v631_v59 = vld [vmem:[%s2350_s7 + $0x478] sm:$0xff]  ;;  %1644 = vst [vmem:[%s2378_s21 + $0x420] sm:$0xff] %v1388_v48  ;;  %1645 = vst [vmem:[%s2378_s21 + $0x428] sm:$0xff] %v1389_v49  ;;  %v1138_v61 = vmul.f32 0.5, %v882_v51  ;;  %v884_v62 = vsub.f32 %v372_v40, %v628_v45  ;;  %v885_v63 = vsub.f32 %v373_v46, %v629_v47  ;;  %v1391_v3 = vadd.f32 %v1135_v55, %v623_v19 }
  0xc0   : > { %v632_v1 = vld [vmem:[%s2350_s7 + $0x480] sm:$0xff]  ;;  %v377_v2 = vld [vmem:[%s2342_s29 + $0x488] sm:$0xff]  ;;  %1646 = vst [vmem:[%s2378_s21 + $0x430] sm:$0xff] %v1390_v54  ;;  %v1392_v4 = vadd.f32 %v1136_v56, %v624_v25  ;;  %v1139_v5 = vmul.f32 0.5, %v883_v57  ;;  %v886_v6 = vsub.f32 %v374_v52, %v630_v53  ;;  %v378_v8 = vld [vmem:[%s2342_s29 + $0x490] sm:$0xff]  ;;  %v1393_v10 = vadd.f32 %v1137_v60, %v625_v31 }
  0xc1   : > { %v633_v7 = vld [vmem:[%s2350_s7 + $0x488] sm:$0xff]  ;;  %v634_v9 = vld [vmem:[%s2350_s7 + $0x490] sm:$0xff]  ;;  %v1394_v11 = vadd.f32 %v1138_v61, %v626_v33  ;;  %v1140_v12 = vmul.f32 0.5, %v884_v62  ;;  %v1141_v13 = vmul.f32 0.5, %v885_v63  ;;  %v379_v14 = vld [vmem:[%s2342_s29 + $0x498] sm:$0xff]  ;;  %1647 = vst [vmem:[%s2378_s21 + $0x438] sm:$0xff] %v1391_v3  ;;  %v887_v19 = vsub.f32 %v375_v58, %v631_v59 }
  0xc2   : > { %v635_v15 = vld [vmem:[%s2350_s7 + $0x498] sm:$0xff]  ;;  %v380_v16 = vld [vmem:[%s2342_s29 + $0x4a0] sm:$0xff]  ;;  %1648 = vst [vmem:[%s2378_s21 + $0x440] sm:$0xff] %v1392_v4  ;;  %v1395_v17 = vadd.f32 %v1139_v5, %v627_v39  ;;  %v1142_v18 = vmul.f32 0.5, %v886_v6  ;;  %v888_v20 = vsub.f32 %v376_v0, %v632_v1  ;;  %v381_v22 = vld [vmem:[%s2342_s29 + $0x4a8] sm:$0xff]  ;;  %v889_v26 = vsub.f32 %v377_v2, %v633_v7 }
  0xc3   : > { %v636_v21 = vld [vmem:[%s2350_s7 + $0x4a0] sm:$0xff]  ;;  %v637_v23 = vld [vmem:[%s2350_s7 + $0x4a8] sm:$0xff]  ;;  %1649 = vst [vmem:[%s2378_s21 + $0x448] sm:$0xff] %v1393_v10  ;;  %1650 = vst [vmem:[%s2378_s21 + $0x450] sm:$0xff] %v1394_v11  ;;  %v1396_v24 = vadd.f32 %v1140_v12, %v628_v45  ;;  %v1397_v25 = vadd.f32 %v1141_v13, %v629_v47  ;;  %v890_v27 = vsub.f32 %v378_v8, %v634_v9  ;;  %v1143_v31 = vmul.f32 0.5, %v887_v19 }
  0xc4   : > { %v382_v28 = vld [vmem:[%s2342_s29 + $0x4b0] sm:$0xff]  ;;  %1651 = vst [vmem:[%s2378_s21 + $0x458] sm:$0xff] %v1395_v17  ;;  %v1398_v30 = vadd.f32 %v1142_v18, %v630_v53  ;;  %v1144_v32 = vmul.f32 0.5, %v888_v20  ;;  %v891_v33 = vsub.f32 %v379_v14, %v635_v15  ;;  %v383_v34 = vld [vmem:[%s2342_s29 + $0x4b8] sm:$0xff]  ;;  %v1145_v36 = vmul.f32 0.5, %v889_v26  ;;  %v384_v40 = vld [vmem:[%s2342_s29 + $0x4c0] sm:$0xff] }
  0xc5   : > { %v638_v29 = vld [vmem:[%s2350_s7 + $0x4b0] sm:$0xff]  ;;  %v639_v35 = vld [vmem:[%s2350_s7 + $0x4b8] sm:$0xff]  ;;  %1652 = vst [vmem:[%s2378_s21 + $0x460] sm:$0xff] %v1396_v24  ;;  %1653 = vst [vmem:[%s2378_s21 + $0x468] sm:$0xff] %v1397_v25  ;;  %v1146_v37 = vmul.f32 0.5, %v890_v27  ;;  %v892_v38 = vsub.f32 %v380_v16, %v636_v21  ;;  %v893_v39 = vsub.f32 %v381_v22, %v637_v23  ;;  %v1399_v43 = vadd.f32 %v1143_v31, %v631_v59 }
  0xc6   : > { %v640_v41 = vld [vmem:[%s2350_s7 + $0x4c0] sm:$0xff]  ;;  %v385_v42 = vld [vmem:[%s2342_s29 + $0x4c8] sm:$0xff]  ;;  %1654 = vst [vmem:[%s2378_s21 + $0x470] sm:$0xff] %v1398_v30  ;;  %v1400_v44 = vadd.f32 %v1144_v32, %v632_v1  ;;  %v1147_v45 = vmul.f32 0.5, %v891_v33  ;;  %v894_v46 = vsub.f32 %v382_v28, %v638_v29  ;;  %v386_v48 = vld [vmem:[%s2342_s29 + $0x4d0] sm:$0xff]  ;;  %v1401_v50 = vadd.f32 %v1145_v36, %v633_v7 }
  0xc7   : > { %v641_v47 = vld [vmem:[%s2350_s7 + $0x4c8] sm:$0xff]  ;;  %v642_v49 = vld [vmem:[%s2350_s7 + $0x4d0] sm:$0xff]  ;;  %v1402_v51 = vadd.f32 %v1146_v37, %v634_v9  ;;  %v1148_v52 = vmul.f32 0.5, %v892_v38  ;;  %v1149_v53 = vmul.f32 0.5, %v893_v39  ;;  %v387_v54 = vld [vmem:[%s2342_s29 + $0x4d8] sm:$0xff]  ;;  %1655 = vst [vmem:[%s2378_s21 + $0x478] sm:$0xff] %v1399_v43  ;;  %v895_v59 = vsub.f32 %v383_v34, %v639_v35 }
  0xc8   : > { %v643_v55 = vld [vmem:[%s2350_s7 + $0x4d8] sm:$0xff]  ;;  %v388_v56 = vld [vmem:[%s2342_s29 + $0x4e0] sm:$0xff]  ;;  %1656 = vst [vmem:[%s2378_s21 + $0x480] sm:$0xff] %v1400_v44  ;;  %v1403_v57 = vadd.f32 %v1147_v45, %v635_v15  ;;  %v1150_v58 = vmul.f32 0.5, %v894_v46  ;;  %v896_v60 = vsub.f32 %v384_v40, %v640_v41  ;;  %v389_v62 = vld [vmem:[%s2342_s29 + $0x4e8] sm:$0xff]  ;;  %v897_v2 = vsub.f32 %v385_v42, %v641_v47 }
  0xc9   : > { %v644_v61 = vld [vmem:[%s2350_s7 + $0x4e0] sm:$0xff]  ;;  %v645_v63 = vld [vmem:[%s2350_s7 + $0x4e8] sm:$0xff]  ;;  %1657 = vst [vmem:[%s2378_s21 + $0x488] sm:$0xff] %v1401_v50  ;;  %1658 = vst [vmem:[%s2378_s21 + $0x490] sm:$0xff] %v1402_v51  ;;  %v1404_v0 = vadd.f32 %v1148_v52, %v636_v21  ;;  %v1405_v1 = vadd.f32 %v1149_v53, %v637_v23  ;;  %v898_v3 = vsub.f32 %v386_v48, %v642_v49  ;;  %v1151_v7 = vmul.f32 0.5, %v895_v59 }
  0xca   : > { %v390_v4 = vld [vmem:[%s2342_s29 + $0x4f0] sm:$0xff]  ;;  %1659 = vst [vmem:[%s2378_s21 + $0x498] sm:$0xff] %v1403_v57  ;;  %v1406_v6 = vadd.f32 %v1150_v58, %v638_v29  ;;  %v1152_v8 = vmul.f32 0.5, %v896_v60  ;;  %v899_v9 = vsub.f32 %v387_v54, %v643_v55  ;;  %v391_v10 = vld [vmem:[%s2342_s29 + $0x4f8] sm:$0xff]  ;;  %v1153_v12 = vmul.f32 0.5, %v897_v2  ;;  %v392_v16 = vld [vmem:[%s2342_s29 + $0x500] sm:$0xff] }
  0xcb   : > { %v646_v5 = vld [vmem:[%s2350_s7 + $0x4f0] sm:$0xff]  ;;  %v647_v11 = vld [vmem:[%s2350_s7 + $0x4f8] sm:$0xff]  ;;  %1660 = vst [vmem:[%s2378_s21 + $0x4a0] sm:$0xff] %v1404_v0  ;;  %1661 = vst [vmem:[%s2378_s21 + $0x4a8] sm:$0xff] %v1405_v1  ;;  %v1154_v13 = vmul.f32 0.5, %v898_v3  ;;  %v900_v14 = vsub.f32 %v388_v56, %v644_v61  ;;  %v901_v15 = vsub.f32 %v389_v62, %v645_v63  ;;  %v1407_v19 = vadd.f32 %v1151_v7, %v639_v35 }
  0xcc   : > { %v648_v17 = vld [vmem:[%s2350_s7 + $0x500] sm:$0xff]  ;;  %v393_v18 = vld [vmem:[%s2342_s29 + $0x508] sm:$0xff]  ;;  %1662 = vst [vmem:[%s2378_s21 + $0x4b0] sm:$0xff] %v1406_v6  ;;  %v1408_v20 = vadd.f32 %v1152_v8, %v640_v41  ;;  %v1155_v21 = vmul.f32 0.5, %v899_v9  ;;  %v902_v22 = vsub.f32 %v390_v4, %v646_v5  ;;  %v394_v24 = vld [vmem:[%s2342_s29 + $0x510] sm:$0xff]  ;;  %v1409_v26 = vadd.f32 %v1153_v12, %v641_v47 }
  0xcd   : > { %v649_v23 = vld [vmem:[%s2350_s7 + $0x508] sm:$0xff]  ;;  %v650_v25 = vld [vmem:[%s2350_s7 + $0x510] sm:$0xff]  ;;  %v1410_v27 = vadd.f32 %v1154_v13, %v642_v49  ;;  %v1156_v28 = vmul.f32 0.5, %v900_v14  ;;  %v1157_v29 = vmul.f32 0.5, %v901_v15  ;;  %v395_v30 = vld [vmem:[%s2342_s29 + $0x518] sm:$0xff]  ;;  %1663 = vst [vmem:[%s2378_s21 + $0x4b8] sm:$0xff] %v1407_v19  ;;  %v903_v35 = vsub.f32 %v391_v10, %v647_v11 }
  0xce   : > { %v651_v31 = vld [vmem:[%s2350_s7 + $0x518] sm:$0xff]  ;;  %v396_v32 = vld [vmem:[%s2342_s29 + $0x520] sm:$0xff]  ;;  %1664 = vst [vmem:[%s2378_s21 + $0x4c0] sm:$0xff] %v1408_v20  ;;  %v1411_v33 = vadd.f32 %v1155_v21, %v643_v55  ;;  %v1158_v34 = vmul.f32 0.5, %v902_v22  ;;  %v904_v36 = vsub.f32 %v392_v16, %v648_v17  ;;  %v397_v38 = vld [vmem:[%s2342_s29 + $0x528] sm:$0xff]  ;;  %v905_v42 = vsub.f32 %v393_v18, %v649_v23 }
  0xcf   : > { %v652_v37 = vld [vmem:[%s2350_s7 + $0x520] sm:$0xff]  ;;  %v653_v39 = vld [vmem:[%s2350_s7 + $0x528] sm:$0xff]  ;;  %1665 = vst [vmem:[%s2378_s21 + $0x4c8] sm:$0xff] %v1409_v26  ;;  %1666 = vst [vmem:[%s2378_s21 + $0x4d0] sm:$0xff] %v1410_v27  ;;  %v1412_v40 = vadd.f32 %v1156_v28, %v644_v61  ;;  %v1413_v41 = vadd.f32 %v1157_v29, %v645_v63  ;;  %v906_v43 = vsub.f32 %v394_v24, %v650_v25  ;;  %v1159_v47 = vmul.f32 0.5, %v903_v35 }
  0xd0   : > { %v398_v44 = vld [vmem:[%s2342_s29 + $0x530] sm:$0xff]  ;;  %1667 = vst [vmem:[%s2378_s21 + $0x4d8] sm:$0xff] %v1411_v33  ;;  %v1414_v46 = vadd.f32 %v1158_v34, %v646_v5  ;;  %v1160_v48 = vmul.f32 0.5, %v904_v36  ;;  %v907_v49 = vsub.f32 %v395_v30, %v651_v31  ;;  %v399_v50 = vld [vmem:[%s2342_s29 + $0x538] sm:$0xff]  ;;  %v1161_v52 = vmul.f32 0.5, %v905_v42  ;;  %v400_v56 = vld [vmem:[%s2342_s29 + $0x540] sm:$0xff] }
  0xd1   : > { %v654_v45 = vld [vmem:[%s2350_s7 + $0x530] sm:$0xff]  ;;  %v655_v51 = vld [vmem:[%s2350_s7 + $0x538] sm:$0xff]  ;;  %1668 = vst [vmem:[%s2378_s21 + $0x4e0] sm:$0xff] %v1412_v40  ;;  %1669 = vst [vmem:[%s2378_s21 + $0x4e8] sm:$0xff] %v1413_v41  ;;  %v1162_v53 = vmul.f32 0.5, %v906_v43  ;;  %v908_v54 = vsub.f32 %v396_v32, %v652_v37  ;;  %v909_v55 = vsub.f32 %v397_v38, %v653_v39  ;;  %v1415_v59 = vadd.f32 %v1159_v47, %v647_v11 }
  0xd2   : > { %v656_v57 = vld [vmem:[%s2350_s7 + $0x540] sm:$0xff]  ;;  %v401_v58 = vld [vmem:[%s2342_s29 + $0x548] sm:$0xff]  ;;  %1670 = vst [vmem:[%s2378_s21 + $0x4f0] sm:$0xff] %v1414_v46  ;;  %v1416_v60 = vadd.f32 %v1160_v48, %v648_v17  ;;  %v1163_v61 = vmul.f32 0.5, %v907_v49  ;;  %v910_v62 = vsub.f32 %v398_v44, %v654_v45  ;;  %v402_v0 = vld [vmem:[%s2342_s29 + $0x550] sm:$0xff]  ;;  %v1417_v2 = vadd.f32 %v1161_v52, %v649_v23 }
  0xd3   : > { %v657_v63 = vld [vmem:[%s2350_s7 + $0x548] sm:$0xff]  ;;  %v658_v1 = vld [vmem:[%s2350_s7 + $0x550] sm:$0xff]  ;;  %v1418_v3 = vadd.f32 %v1162_v53, %v650_v25  ;;  %v1164_v4 = vmul.f32 0.5, %v908_v54  ;;  %v1165_v5 = vmul.f32 0.5, %v909_v55  ;;  %v403_v6 = vld [vmem:[%s2342_s29 + $0x558] sm:$0xff]  ;;  %1671 = vst [vmem:[%s2378_s21 + $0x4f8] sm:$0xff] %v1415_v59  ;;  %v911_v11 = vsub.f32 %v399_v50, %v655_v51 }
  0xd4   : > { %v659_v7 = vld [vmem:[%s2350_s7 + $0x558] sm:$0xff]  ;;  %v404_v8 = vld [vmem:[%s2342_s29 + $0x560] sm:$0xff]  ;;  %1672 = vst [vmem:[%s2378_s21 + $0x500] sm:$0xff] %v1416_v60  ;;  %v1419_v9 = vadd.f32 %v1163_v61, %v651_v31  ;;  %v1166_v10 = vmul.f32 0.5, %v910_v62  ;;  %v912_v12 = vsub.f32 %v400_v56, %v656_v57  ;;  %v405_v14 = vld [vmem:[%s2342_s29 + $0x568] sm:$0xff]  ;;  %v913_v18 = vsub.f32 %v401_v58, %v657_v63 }
  0xd5   : > { %v660_v13 = vld [vmem:[%s2350_s7 + $0x560] sm:$0xff]  ;;  %v661_v15 = vld [vmem:[%s2350_s7 + $0x568] sm:$0xff]  ;;  %1673 = vst [vmem:[%s2378_s21 + $0x508] sm:$0xff] %v1417_v2  ;;  %1674 = vst [vmem:[%s2378_s21 + $0x510] sm:$0xff] %v1418_v3  ;;  %v1420_v16 = vadd.f32 %v1164_v4, %v652_v37  ;;  %v1421_v17 = vadd.f32 %v1165_v5, %v653_v39  ;;  %v914_v19 = vsub.f32 %v402_v0, %v658_v1  ;;  %v1167_v23 = vmul.f32 0.5, %v911_v11 }
  0xd6   : > { %v406_v20 = vld [vmem:[%s2342_s29 + $0x570] sm:$0xff]  ;;  %1675 = vst [vmem:[%s2378_s21 + $0x518] sm:$0xff] %v1419_v9  ;;  %v1422_v22 = vadd.f32 %v1166_v10, %v654_v45  ;;  %v1168_v24 = vmul.f32 0.5, %v912_v12  ;;  %v915_v25 = vsub.f32 %v403_v6, %v659_v7  ;;  %v407_v26 = vld [vmem:[%s2342_s29 + $0x578] sm:$0xff]  ;;  %v1169_v28 = vmul.f32 0.5, %v913_v18  ;;  %v408_v32 = vld [vmem:[%s2342_s29 + $0x580] sm:$0xff] }
  0xd7   : > { %v662_v21 = vld [vmem:[%s2350_s7 + $0x570] sm:$0xff]  ;;  %v663_v27 = vld [vmem:[%s2350_s7 + $0x578] sm:$0xff]  ;;  %1676 = vst [vmem:[%s2378_s21 + $0x520] sm:$0xff] %v1420_v16  ;;  %1677 = vst [vmem:[%s2378_s21 + $0x528] sm:$0xff] %v1421_v17  ;;  %v1170_v29 = vmul.f32 0.5, %v914_v19  ;;  %v916_v30 = vsub.f32 %v404_v8, %v660_v13  ;;  %v917_v31 = vsub.f32 %v405_v14, %v661_v15  ;;  %v1423_v35 = vadd.f32 %v1167_v23, %v655_v51 }
  0xd8   : > { %v664_v33 = vld [vmem:[%s2350_s7 + $0x580] sm:$0xff]  ;;  %v409_v34 = vld [vmem:[%s2342_s29 + $0x588] sm:$0xff]  ;;  %1678 = vst [vmem:[%s2378_s21 + $0x530] sm:$0xff] %v1422_v22  ;;  %v1424_v36 = vadd.f32 %v1168_v24, %v656_v57  ;;  %v1171_v37 = vmul.f32 0.5, %v915_v25  ;;  %v918_v38 = vsub.f32 %v406_v20, %v662_v21  ;;  %v410_v40 = vld [vmem:[%s2342_s29 + $0x590] sm:$0xff]  ;;  %v1425_v42 = vadd.f32 %v1169_v28, %v657_v63 }
  0xd9   : > { %v665_v39 = vld [vmem:[%s2350_s7 + $0x588] sm:$0xff]  ;;  %v666_v41 = vld [vmem:[%s2350_s7 + $0x590] sm:$0xff]  ;;  %v1426_v43 = vadd.f32 %v1170_v29, %v658_v1  ;;  %v1172_v44 = vmul.f32 0.5, %v916_v30  ;;  %v1173_v45 = vmul.f32 0.5, %v917_v31  ;;  %v411_v46 = vld [vmem:[%s2342_s29 + $0x598] sm:$0xff]  ;;  %1679 = vst [vmem:[%s2378_s21 + $0x538] sm:$0xff] %v1423_v35  ;;  %v919_v51 = vsub.f32 %v407_v26, %v663_v27 }
  0xda   : > { %v667_v47 = vld [vmem:[%s2350_s7 + $0x598] sm:$0xff]  ;;  %v412_v48 = vld [vmem:[%s2342_s29 + $0x5a0] sm:$0xff]  ;;  %1680 = vst [vmem:[%s2378_s21 + $0x540] sm:$0xff] %v1424_v36  ;;  %v1427_v49 = vadd.f32 %v1171_v37, %v659_v7  ;;  %v1174_v50 = vmul.f32 0.5, %v918_v38  ;;  %v920_v52 = vsub.f32 %v408_v32, %v664_v33  ;;  %v413_v54 = vld [vmem:[%s2342_s29 + $0x5a8] sm:$0xff]  ;;  %v921_v58 = vsub.f32 %v409_v34, %v665_v39 }
  0xdb   : > { %v668_v53 = vld [vmem:[%s2350_s7 + $0x5a0] sm:$0xff]  ;;  %v669_v55 = vld [vmem:[%s2350_s7 + $0x5a8] sm:$0xff]  ;;  %1681 = vst [vmem:[%s2378_s21 + $0x548] sm:$0xff] %v1425_v42  ;;  %1682 = vst [vmem:[%s2378_s21 + $0x550] sm:$0xff] %v1426_v43  ;;  %v1428_v56 = vadd.f32 %v1172_v44, %v660_v13  ;;  %v1429_v57 = vadd.f32 %v1173_v45, %v661_v15  ;;  %v922_v59 = vsub.f32 %v410_v40, %v666_v41  ;;  %v1175_v63 = vmul.f32 0.5, %v919_v51 }
  0xdc   : > { %v414_v60 = vld [vmem:[%s2342_s29 + $0x5b0] sm:$0xff]  ;;  %1683 = vst [vmem:[%s2378_s21 + $0x558] sm:$0xff] %v1427_v49  ;;  %v1430_v62 = vadd.f32 %v1174_v50, %v662_v21  ;;  %v1176_v0 = vmul.f32 0.5, %v920_v52  ;;  %v923_v1 = vsub.f32 %v411_v46, %v667_v47  ;;  %v415_v2 = vld [vmem:[%s2342_s29 + $0x5b8] sm:$0xff]  ;;  %v1177_v4 = vmul.f32 0.5, %v921_v58  ;;  %v416_v8 = vld [vmem:[%s2342_s29 + $0x5c0] sm:$0xff] }
  0xdd   : > { %v670_v61 = vld [vmem:[%s2350_s7 + $0x5b0] sm:$0xff]  ;;  %v671_v3 = vld [vmem:[%s2350_s7 + $0x5b8] sm:$0xff]  ;;  %1684 = vst [vmem:[%s2378_s21 + $0x560] sm:$0xff] %v1428_v56  ;;  %1685 = vst [vmem:[%s2378_s21 + $0x568] sm:$0xff] %v1429_v57  ;;  %v1178_v5 = vmul.f32 0.5, %v922_v59  ;;  %v924_v6 = vsub.f32 %v412_v48, %v668_v53  ;;  %v925_v7 = vsub.f32 %v413_v54, %v669_v55  ;;  %v1431_v11 = vadd.f32 %v1175_v63, %v663_v27 }
  0xde   : > { %v672_v9 = vld [vmem:[%s2350_s7 + $0x5c0] sm:$0xff]  ;;  %v417_v10 = vld [vmem:[%s2342_s29 + $0x5c8] sm:$0xff]  ;;  %1686 = vst [vmem:[%s2378_s21 + $0x570] sm:$0xff] %v1430_v62  ;;  %v1432_v12 = vadd.f32 %v1176_v0, %v664_v33  ;;  %v1179_v13 = vmul.f32 0.5, %v923_v1  ;;  %v926_v14 = vsub.f32 %v414_v60, %v670_v61  ;;  %v418_v16 = vld [vmem:[%s2342_s29 + $0x5d0] sm:$0xff]  ;;  %v1433_v18 = vadd.f32 %v1177_v4, %v665_v39 }
  0xdf   : > { %v673_v15 = vld [vmem:[%s2350_s7 + $0x5c8] sm:$0xff]  ;;  %v674_v17 = vld [vmem:[%s2350_s7 + $0x5d0] sm:$0xff]  ;;  %v1434_v19 = vadd.f32 %v1178_v5, %v666_v41  ;;  %v1180_v20 = vmul.f32 0.5, %v924_v6  ;;  %v1181_v21 = vmul.f32 0.5, %v925_v7  ;;  %v419_v22 = vld [vmem:[%s2342_s29 + $0x5d8] sm:$0xff]  ;;  %1687 = vst [vmem:[%s2378_s21 + $0x578] sm:$0xff] %v1431_v11  ;;  %v927_v27 = vsub.f32 %v415_v2, %v671_v3 }
  0xe0   : > { %v675_v23 = vld [vmem:[%s2350_s7 + $0x5d8] sm:$0xff]  ;;  %v420_v24 = vld [vmem:[%s2342_s29 + $0x5e0] sm:$0xff]  ;;  %1688 = vst [vmem:[%s2378_s21 + $0x580] sm:$0xff] %v1432_v12  ;;  %v1435_v25 = vadd.f32 %v1179_v13, %v667_v47  ;;  %v1182_v26 = vmul.f32 0.5, %v926_v14  ;;  %v928_v28 = vsub.f32 %v416_v8, %v672_v9  ;;  %v421_v30 = vld [vmem:[%s2342_s29 + $0x5e8] sm:$0xff]  ;;  %v929_v34 = vsub.f32 %v417_v10, %v673_v15 }
  0xe1   : > { %v676_v29 = vld [vmem:[%s2350_s7 + $0x5e0] sm:$0xff]  ;;  %v677_v31 = vld [vmem:[%s2350_s7 + $0x5e8] sm:$0xff]  ;;  %1689 = vst [vmem:[%s2378_s21 + $0x588] sm:$0xff] %v1433_v18  ;;  %1690 = vst [vmem:[%s2378_s21 + $0x590] sm:$0xff] %v1434_v19  ;;  %v1436_v32 = vadd.f32 %v1180_v20, %v668_v53  ;;  %v1437_v33 = vadd.f32 %v1181_v21, %v669_v55  ;;  %v930_v35 = vsub.f32 %v418_v16, %v674_v17  ;;  %v1183_v39 = vmul.f32 0.5, %v927_v27 }
  0xe2   : > { %v422_v36 = vld [vmem:[%s2342_s29 + $0x5f0] sm:$0xff]  ;;  %1691 = vst [vmem:[%s2378_s21 + $0x598] sm:$0xff] %v1435_v25  ;;  %v1438_v38 = vadd.f32 %v1182_v26, %v670_v61  ;;  %v1184_v40 = vmul.f32 0.5, %v928_v28  ;;  %v931_v41 = vsub.f32 %v419_v22, %v675_v23  ;;  %v423_v42 = vld [vmem:[%s2342_s29 + $0x5f8] sm:$0xff]  ;;  %v1185_v44 = vmul.f32 0.5, %v929_v34  ;;  %v424_v48 = vld [vmem:[%s2342_s29 + $0x600] sm:$0xff] }
  0xe3   : > { %v678_v37 = vld [vmem:[%s2350_s7 + $0x5f0] sm:$0xff]  ;;  %v679_v43 = vld [vmem:[%s2350_s7 + $0x5f8] sm:$0xff]  ;;  %1692 = vst [vmem:[%s2378_s21 + $0x5a0] sm:$0xff] %v1436_v32  ;;  %1693 = vst [vmem:[%s2378_s21 + $0x5a8] sm:$0xff] %v1437_v33  ;;  %v1186_v45 = vmul.f32 0.5, %v930_v35  ;;  %v932_v46 = vsub.f32 %v420_v24, %v676_v29  ;;  %v933_v47 = vsub.f32 %v421_v30, %v677_v31  ;;  %v1439_v51 = vadd.f32 %v1183_v39, %v671_v3 }
  0xe4   : > { %v680_v49 = vld [vmem:[%s2350_s7 + $0x600] sm:$0xff]  ;;  %v425_v50 = vld [vmem:[%s2342_s29 + $0x608] sm:$0xff]  ;;  %1694 = vst [vmem:[%s2378_s21 + $0x5b0] sm:$0xff] %v1438_v38  ;;  %v1440_v52 = vadd.f32 %v1184_v40, %v672_v9  ;;  %v1187_v53 = vmul.f32 0.5, %v931_v41  ;;  %v934_v54 = vsub.f32 %v422_v36, %v678_v37  ;;  %v426_v56 = vld [vmem:[%s2342_s29 + $0x610] sm:$0xff]  ;;  %v1441_v58 = vadd.f32 %v1185_v44, %v673_v15 }
  0xe5   : > { %v681_v55 = vld [vmem:[%s2350_s7 + $0x608] sm:$0xff]  ;;  %v682_v57 = vld [vmem:[%s2350_s7 + $0x610] sm:$0xff]  ;;  %v1442_v59 = vadd.f32 %v1186_v45, %v674_v17  ;;  %v1188_v60 = vmul.f32 0.5, %v932_v46  ;;  %v1189_v61 = vmul.f32 0.5, %v933_v47  ;;  %v427_v62 = vld [vmem:[%s2342_s29 + $0x618] sm:$0xff]  ;;  %1695 = vst [vmem:[%s2378_s21 + $0x5b8] sm:$0xff] %v1439_v51  ;;  %v935_v3 = vsub.f32 %v423_v42, %v679_v43 }
  0xe6   : > { %v683_v63 = vld [vmem:[%s2350_s7 + $0x618] sm:$0xff]  ;;  %v428_v0 = vld [vmem:[%s2342_s29 + $0x620] sm:$0xff]  ;;  %1696 = vst [vmem:[%s2378_s21 + $0x5c0] sm:$0xff] %v1440_v52  ;;  %v1443_v1 = vadd.f32 %v1187_v53, %v675_v23  ;;  %v1190_v2 = vmul.f32 0.5, %v934_v54  ;;  %v936_v4 = vsub.f32 %v424_v48, %v680_v49  ;;  %v429_v6 = vld [vmem:[%s2342_s29 + $0x628] sm:$0xff]  ;;  %v937_v10 = vsub.f32 %v425_v50, %v681_v55 }
  0xe7   : > { %v684_v5 = vld [vmem:[%s2350_s7 + $0x620] sm:$0xff]  ;;  %v685_v7 = vld [vmem:[%s2350_s7 + $0x628] sm:$0xff]  ;;  %1697 = vst [vmem:[%s2378_s21 + $0x5c8] sm:$0xff] %v1441_v58  ;;  %1698 = vst [vmem:[%s2378_s21 + $0x5d0] sm:$0xff] %v1442_v59  ;;  %v1444_v8 = vadd.f32 %v1188_v60, %v676_v29  ;;  %v1445_v9 = vadd.f32 %v1189_v61, %v677_v31  ;;  %v938_v11 = vsub.f32 %v426_v56, %v682_v57  ;;  %v1191_v15 = vmul.f32 0.5, %v935_v3 }
  0xe8   : > { %v430_v12 = vld [vmem:[%s2342_s29 + $0x630] sm:$0xff]  ;;  %1699 = vst [vmem:[%s2378_s21 + $0x5d8] sm:$0xff] %v1443_v1  ;;  %v1446_v14 = vadd.f32 %v1190_v2, %v678_v37  ;;  %v1192_v16 = vmul.f32 0.5, %v936_v4  ;;  %v939_v17 = vsub.f32 %v427_v62, %v683_v63  ;;  %v431_v18 = vld [vmem:[%s2342_s29 + $0x638] sm:$0xff]  ;;  %v1193_v20 = vmul.f32 0.5, %v937_v10  ;;  %v432_v24 = vld [vmem:[%s2342_s29 + $0x640] sm:$0xff] }
  0xe9   : > { %v686_v13 = vld [vmem:[%s2350_s7 + $0x630] sm:$0xff]  ;;  %v687_v19 = vld [vmem:[%s2350_s7 + $0x638] sm:$0xff]  ;;  %1700 = vst [vmem:[%s2378_s21 + $0x5e0] sm:$0xff] %v1444_v8  ;;  %1701 = vst [vmem:[%s2378_s21 + $0x5e8] sm:$0xff] %v1445_v9  ;;  %v1194_v21 = vmul.f32 0.5, %v938_v11  ;;  %v940_v22 = vsub.f32 %v428_v0, %v684_v5  ;;  %v941_v23 = vsub.f32 %v429_v6, %v685_v7  ;;  %v1447_v27 = vadd.f32 %v1191_v15, %v679_v43 }
  0xea   : > { %v688_v25 = vld [vmem:[%s2350_s7 + $0x640] sm:$0xff]  ;;  %v433_v26 = vld [vmem:[%s2342_s29 + $0x648] sm:$0xff]  ;;  %1702 = vst [vmem:[%s2378_s21 + $0x5f0] sm:$0xff] %v1446_v14  ;;  %v1448_v28 = vadd.f32 %v1192_v16, %v680_v49  ;;  %v1195_v29 = vmul.f32 0.5, %v939_v17  ;;  %v942_v30 = vsub.f32 %v430_v12, %v686_v13  ;;  %v434_v32 = vld [vmem:[%s2342_s29 + $0x650] sm:$0xff]  ;;  %v1449_v34 = vadd.f32 %v1193_v20, %v681_v55 }
  0xeb   : > { %v689_v31 = vld [vmem:[%s2350_s7 + $0x648] sm:$0xff]  ;;  %v690_v33 = vld [vmem:[%s2350_s7 + $0x650] sm:$0xff]  ;;  %v1450_v35 = vadd.f32 %v1194_v21, %v682_v57  ;;  %v1196_v36 = vmul.f32 0.5, %v940_v22  ;;  %v1197_v37 = vmul.f32 0.5, %v941_v23  ;;  %v435_v38 = vld [vmem:[%s2342_s29 + $0x658] sm:$0xff]  ;;  %1703 = vst [vmem:[%s2378_s21 + $0x5f8] sm:$0xff] %v1447_v27  ;;  %v943_v43 = vsub.f32 %v431_v18, %v687_v19 }
  0xec   : > { %v691_v39 = vld [vmem:[%s2350_s7 + $0x658] sm:$0xff]  ;;  %v436_v40 = vld [vmem:[%s2342_s29 + $0x660] sm:$0xff]  ;;  %1704 = vst [vmem:[%s2378_s21 + $0x600] sm:$0xff] %v1448_v28  ;;  %v1451_v41 = vadd.f32 %v1195_v29, %v683_v63  ;;  %v1198_v42 = vmul.f32 0.5, %v942_v30  ;;  %v944_v44 = vsub.f32 %v432_v24, %v688_v25  ;;  %v437_v46 = vld [vmem:[%s2342_s29 + $0x668] sm:$0xff]  ;;  %v945_v50 = vsub.f32 %v433_v26, %v689_v31 }
  0xed   : > { %v692_v45 = vld [vmem:[%s2350_s7 + $0x660] sm:$0xff]  ;;  %v693_v47 = vld [vmem:[%s2350_s7 + $0x668] sm:$0xff]  ;;  %1705 = vst [vmem:[%s2378_s21 + $0x608] sm:$0xff] %v1449_v34  ;;  %1706 = vst [vmem:[%s2378_s21 + $0x610] sm:$0xff] %v1450_v35  ;;  %v1452_v48 = vadd.f32 %v1196_v36, %v684_v5  ;;  %v1453_v49 = vadd.f32 %v1197_v37, %v685_v7  ;;  %v946_v51 = vsub.f32 %v434_v32, %v690_v33  ;;  %v1199_v55 = vmul.f32 0.5, %v943_v43 }
  0xee   : > { %v438_v52 = vld [vmem:[%s2342_s29 + $0x670] sm:$0xff]  ;;  %1707 = vst [vmem:[%s2378_s21 + $0x618] sm:$0xff] %v1451_v41  ;;  %v1454_v54 = vadd.f32 %v1198_v42, %v686_v13  ;;  %v1200_v56 = vmul.f32 0.5, %v944_v44  ;;  %v947_v57 = vsub.f32 %v435_v38, %v691_v39  ;;  %v439_v58 = vld [vmem:[%s2342_s29 + $0x678] sm:$0xff]  ;;  %v1201_v60 = vmul.f32 0.5, %v945_v50  ;;  %v440_v0 = vld [vmem:[%s2342_s29 + $0x680] sm:$0xff] }
  0xef   : > { %v694_v53 = vld [vmem:[%s2350_s7 + $0x670] sm:$0xff]  ;;  %v695_v59 = vld [vmem:[%s2350_s7 + $0x678] sm:$0xff]  ;;  %1708 = vst [vmem:[%s2378_s21 + $0x620] sm:$0xff] %v1452_v48  ;;  %1709 = vst [vmem:[%s2378_s21 + $0x628] sm:$0xff] %v1453_v49  ;;  %v1202_v61 = vmul.f32 0.5, %v946_v51  ;;  %v948_v62 = vsub.f32 %v436_v40, %v692_v45  ;;  %v949_v63 = vsub.f32 %v437_v46, %v693_v47  ;;  %v1455_v3 = vadd.f32 %v1199_v55, %v687_v19 }
  0xf0   : > { %v696_v1 = vld [vmem:[%s2350_s7 + $0x680] sm:$0xff]  ;;  %v441_v2 = vld [vmem:[%s2342_s29 + $0x688] sm:$0xff]  ;;  %1710 = vst [vmem:[%s2378_s21 + $0x630] sm:$0xff] %v1454_v54  ;;  %v1456_v4 = vadd.f32 %v1200_v56, %v688_v25  ;;  %v1203_v5 = vmul.f32 0.5, %v947_v57  ;;  %v950_v6 = vsub.f32 %v438_v52, %v694_v53  ;;  %v442_v8 = vld [vmem:[%s2342_s29 + $0x690] sm:$0xff]  ;;  %v1457_v10 = vadd.f32 %v1201_v60, %v689_v31 }
  0xf1   : > { %v697_v7 = vld [vmem:[%s2350_s7 + $0x688] sm:$0xff]  ;;  %v698_v9 = vld [vmem:[%s2350_s7 + $0x690] sm:$0xff]  ;;  %v1458_v11 = vadd.f32 %v1202_v61, %v690_v33  ;;  %v1204_v12 = vmul.f32 0.5, %v948_v62  ;;  %v1205_v13 = vmul.f32 0.5, %v949_v63  ;;  %v443_v14 = vld [vmem:[%s2342_s29 + $0x698] sm:$0xff]  ;;  %1711 = vst [vmem:[%s2378_s21 + $0x638] sm:$0xff] %v1455_v3  ;;  %v951_v19 = vsub.f32 %v439_v58, %v695_v59 }
  0xf2   : > { %v699_v15 = vld [vmem:[%s2350_s7 + $0x698] sm:$0xff]  ;;  %v444_v16 = vld [vmem:[%s2342_s29 + $0x6a0] sm:$0xff]  ;;  %1712 = vst [vmem:[%s2378_s21 + $0x640] sm:$0xff] %v1456_v4  ;;  %v1459_v17 = vadd.f32 %v1203_v5, %v691_v39  ;;  %v1206_v18 = vmul.f32 0.5, %v950_v6  ;;  %v952_v20 = vsub.f32 %v440_v0, %v696_v1  ;;  %v445_v22 = vld [vmem:[%s2342_s29 + $0x6a8] sm:$0xff]  ;;  %v953_v26 = vsub.f32 %v441_v2, %v697_v7 }
  0xf3   : > { %v700_v21 = vld [vmem:[%s2350_s7 + $0x6a0] sm:$0xff]  ;;  %v701_v23 = vld [vmem:[%s2350_s7 + $0x6a8] sm:$0xff]  ;;  %1713 = vst [vmem:[%s2378_s21 + $0x648] sm:$0xff] %v1457_v10  ;;  %1714 = vst [vmem:[%s2378_s21 + $0x650] sm:$0xff] %v1458_v11  ;;  %v1460_v24 = vadd.f32 %v1204_v12, %v692_v45  ;;  %v1461_v25 = vadd.f32 %v1205_v13, %v693_v47  ;;  %v954_v27 = vsub.f32 %v442_v8, %v698_v9  ;;  %v1207_v31 = vmul.f32 0.5, %v951_v19 }
  0xf4   : > { %v446_v28 = vld [vmem:[%s2342_s29 + $0x6b0] sm:$0xff]  ;;  %1715 = vst [vmem:[%s2378_s21 + $0x658] sm:$0xff] %v1459_v17  ;;  %v1462_v30 = vadd.f32 %v1206_v18, %v694_v53  ;;  %v1208_v32 = vmul.f32 0.5, %v952_v20  ;;  %v955_v33 = vsub.f32 %v443_v14, %v699_v15  ;;  %v447_v34 = vld [vmem:[%s2342_s29 + $0x6b8] sm:$0xff]  ;;  %v1209_v36 = vmul.f32 0.5, %v953_v26  ;;  %v448_v40 = vld [vmem:[%s2342_s29 + $0x6c0] sm:$0xff] }
  0xf5   : > { %v702_v29 = vld [vmem:[%s2350_s7 + $0x6b0] sm:$0xff]  ;;  %v703_v35 = vld [vmem:[%s2350_s7 + $0x6b8] sm:$0xff]  ;;  %1716 = vst [vmem:[%s2378_s21 + $0x660] sm:$0xff] %v1460_v24  ;;  %1717 = vst [vmem:[%s2378_s21 + $0x668] sm:$0xff] %v1461_v25  ;;  %v1210_v37 = vmul.f32 0.5, %v954_v27  ;;  %v956_v38 = vsub.f32 %v444_v16, %v700_v21  ;;  %v957_v39 = vsub.f32 %v445_v22, %v701_v23  ;;  %v1463_v43 = vadd.f32 %v1207_v31, %v695_v59 }
  0xf6   : > { %v704_v41 = vld [vmem:[%s2350_s7 + $0x6c0] sm:$0xff]  ;;  %v449_v42 = vld [vmem:[%s2342_s29 + $0x6c8] sm:$0xff]  ;;  %1718 = vst [vmem:[%s2378_s21 + $0x670] sm:$0xff] %v1462_v30  ;;  %v1464_v44 = vadd.f32 %v1208_v32, %v696_v1  ;;  %v1211_v45 = vmul.f32 0.5, %v955_v33  ;;  %v958_v46 = vsub.f32 %v446_v28, %v702_v29  ;;  %v450_v48 = vld [vmem:[%s2342_s29 + $0x6d0] sm:$0xff]  ;;  %v1465_v50 = vadd.f32 %v1209_v36, %v697_v7 }
  0xf7   : > { %v705_v47 = vld [vmem:[%s2350_s7 + $0x6c8] sm:$0xff]  ;;  %v706_v49 = vld [vmem:[%s2350_s7 + $0x6d0] sm:$0xff]  ;;  %v1466_v51 = vadd.f32 %v1210_v37, %v698_v9  ;;  %v1212_v52 = vmul.f32 0.5, %v956_v38  ;;  %v1213_v53 = vmul.f32 0.5, %v957_v39  ;;  %v451_v54 = vld [vmem:[%s2342_s29 + $0x6d8] sm:$0xff]  ;;  %1719 = vst [vmem:[%s2378_s21 + $0x678] sm:$0xff] %v1463_v43  ;;  %v959_v59 = vsub.f32 %v447_v34, %v703_v35 }
  0xf8   : > { %v707_v55 = vld [vmem:[%s2350_s7 + $0x6d8] sm:$0xff]  ;;  %v452_v56 = vld [vmem:[%s2342_s29 + $0x6e0] sm:$0xff]  ;;  %1720 = vst [vmem:[%s2378_s21 + $0x680] sm:$0xff] %v1464_v44  ;;  %v1467_v57 = vadd.f32 %v1211_v45, %v699_v15  ;;  %v1214_v58 = vmul.f32 0.5, %v958_v46  ;;  %v960_v60 = vsub.f32 %v448_v40, %v704_v41  ;;  %v453_v62 = vld [vmem:[%s2342_s29 + $0x6e8] sm:$0xff]  ;;  %v961_v2 = vsub.f32 %v449_v42, %v705_v47 }
  0xf9   : > { %v708_v61 = vld [vmem:[%s2350_s7 + $0x6e0] sm:$0xff]  ;;  %v709_v63 = vld [vmem:[%s2350_s7 + $0x6e8] sm:$0xff]  ;;  %1721 = vst [vmem:[%s2378_s21 + $0x688] sm:$0xff] %v1465_v50  ;;  %1722 = vst [vmem:[%s2378_s21 + $0x690] sm:$0xff] %v1466_v51  ;;  %v1468_v0 = vadd.f32 %v1212_v52, %v700_v21  ;;  %v1469_v1 = vadd.f32 %v1213_v53, %v701_v23  ;;  %v962_v3 = vsub.f32 %v450_v48, %v706_v49  ;;  %v1215_v7 = vmul.f32 0.5, %v959_v59 }
  0xfa   : > { %v454_v4 = vld [vmem:[%s2342_s29 + $0x6f0] sm:$0xff]  ;;  %1723 = vst [vmem:[%s2378_s21 + $0x698] sm:$0xff] %v1467_v57  ;;  %v1470_v6 = vadd.f32 %v1214_v58, %v702_v29  ;;  %v1216_v8 = vmul.f32 0.5, %v960_v60  ;;  %v963_v9 = vsub.f32 %v451_v54, %v707_v55  ;;  %v455_v10 = vld [vmem:[%s2342_s29 + $0x6f8] sm:$0xff]  ;;  %v1217_v12 = vmul.f32 0.5, %v961_v2  ;;  %v456_v16 = vld [vmem:[%s2342_s29 + $0x700] sm:$0xff] }
  0xfb   : > { %v710_v5 = vld [vmem:[%s2350_s7 + $0x6f0] sm:$0xff]  ;;  %v711_v11 = vld [vmem:[%s2350_s7 + $0x6f8] sm:$0xff]  ;;  %1724 = vst [vmem:[%s2378_s21 + $0x6a0] sm:$0xff] %v1468_v0  ;;  %1725 = vst [vmem:[%s2378_s21 + $0x6a8] sm:$0xff] %v1469_v1  ;;  %v1218_v13 = vmul.f32 0.5, %v962_v3  ;;  %v964_v14 = vsub.f32 %v452_v56, %v708_v61  ;;  %v965_v15 = vsub.f32 %v453_v62, %v709_v63  ;;  %v1471_v19 = vadd.f32 %v1215_v7, %v703_v35 }
  0xfc   : > { %v712_v17 = vld [vmem:[%s2350_s7 + $0x700] sm:$0xff]  ;;  %v457_v18 = vld [vmem:[%s2342_s29 + $0x708] sm:$0xff]  ;;  %1726 = vst [vmem:[%s2378_s21 + $0x6b0] sm:$0xff] %v1470_v6  ;;  %v1472_v20 = vadd.f32 %v1216_v8, %v704_v41  ;;  %v1219_v21 = vmul.f32 0.5, %v963_v9  ;;  %v966_v22 = vsub.f32 %v454_v4, %v710_v5  ;;  %v458_v24 = vld [vmem:[%s2342_s29 + $0x710] sm:$0xff]  ;;  %v1473_v26 = vadd.f32 %v1217_v12, %v705_v47 }
  0xfd   : > { %v713_v23 = vld [vmem:[%s2350_s7 + $0x708] sm:$0xff]  ;;  %v714_v25 = vld [vmem:[%s2350_s7 + $0x710] sm:$0xff]  ;;  %v1474_v27 = vadd.f32 %v1218_v13, %v706_v49  ;;  %v1220_v28 = vmul.f32 0.5, %v964_v14  ;;  %v1221_v29 = vmul.f32 0.5, %v965_v15  ;;  %v459_v30 = vld [vmem:[%s2342_s29 + $0x718] sm:$0xff]  ;;  %1727 = vst [vmem:[%s2378_s21 + $0x6b8] sm:$0xff] %v1471_v19  ;;  %v967_v35 = vsub.f32 %v455_v10, %v711_v11 }
  0xfe   : > { %v715_v31 = vld [vmem:[%s2350_s7 + $0x718] sm:$0xff]  ;;  %v460_v32 = vld [vmem:[%s2342_s29 + $0x720] sm:$0xff]  ;;  %1728 = vst [vmem:[%s2378_s21 + $0x6c0] sm:$0xff] %v1472_v20  ;;  %v1475_v33 = vadd.f32 %v1219_v21, %v707_v55  ;;  %v1222_v34 = vmul.f32 0.5, %v966_v22  ;;  %v968_v36 = vsub.f32 %v456_v16, %v712_v17  ;;  %v461_v38 = vld [vmem:[%s2342_s29 + $0x728] sm:$0xff]  ;;  %v969_v42 = vsub.f32 %v457_v18, %v713_v23 }
  0xff   : > { %v716_v37 = vld [vmem:[%s2350_s7 + $0x720] sm:$0xff]  ;;  %v717_v39 = vld [vmem:[%s2350_s7 + $0x728] sm:$0xff]  ;;  %1729 = vst [vmem:[%s2378_s21 + $0x6c8] sm:$0xff] %v1473_v26  ;;  %1730 = vst [vmem:[%s2378_s21 + $0x6d0] sm:$0xff] %v1474_v27  ;;  %v1476_v40 = vadd.f32 %v1220_v28, %v708_v61  ;;  %v1477_v41 = vadd.f32 %v1221_v29, %v709_v63  ;;  %v970_v43 = vsub.f32 %v458_v24, %v714_v25  ;;  %v1223_v47 = vmul.f32 0.5, %v967_v35 }
 0x100   : > { %v462_v44 = vld [vmem:[%s2342_s29 + $0x730] sm:$0xff]  ;;  %1731 = vst [vmem:[%s2378_s21 + $0x6d8] sm:$0xff] %v1475_v33  ;;  %v1478_v46 = vadd.f32 %v1222_v34, %v710_v5  ;;  %v1224_v48 = vmul.f32 0.5, %v968_v36  ;;  %v971_v49 = vsub.f32 %v459_v30, %v715_v31  ;;  %v463_v50 = vld [vmem:[%s2342_s29 + $0x738] sm:$0xff]  ;;  %v1225_v52 = vmul.f32 0.5, %v969_v42  ;;  %v464_v56 = vld [vmem:[%s2342_s29 + $0x740] sm:$0xff] }
 0x101   : > { %v718_v45 = vld [vmem:[%s2350_s7 + $0x730] sm:$0xff]  ;;  %v719_v51 = vld [vmem:[%s2350_s7 + $0x738] sm:$0xff]  ;;  %1732 = vst [vmem:[%s2378_s21 + $0x6e0] sm:$0xff] %v1476_v40  ;;  %1733 = vst [vmem:[%s2378_s21 + $0x6e8] sm:$0xff] %v1477_v41  ;;  %v1226_v53 = vmul.f32 0.5, %v970_v43  ;;  %v972_v54 = vsub.f32 %v460_v32, %v716_v37  ;;  %v973_v55 = vsub.f32 %v461_v38, %v717_v39  ;;  %v1479_v59 = vadd.f32 %v1223_v47, %v711_v11 }
 0x102   : > { %v720_v57 = vld [vmem:[%s2350_s7 + $0x740] sm:$0xff]  ;;  %v465_v58 = vld [vmem:[%s2342_s29 + $0x748] sm:$0xff]  ;;  %1734 = vst [vmem:[%s2378_s21 + $0x6f0] sm:$0xff] %v1478_v46  ;;  %v1480_v60 = vadd.f32 %v1224_v48, %v712_v17  ;;  %v1227_v61 = vmul.f32 0.5, %v971_v49  ;;  %v974_v62 = vsub.f32 %v462_v44, %v718_v45  ;;  %v466_v0 = vld [vmem:[%s2342_s29 + $0x750] sm:$0xff]  ;;  %v1481_v2 = vadd.f32 %v1225_v52, %v713_v23 }
 0x103   : > { %v721_v63 = vld [vmem:[%s2350_s7 + $0x748] sm:$0xff]  ;;  %v722_v1 = vld [vmem:[%s2350_s7 + $0x750] sm:$0xff]  ;;  %v1482_v3 = vadd.f32 %v1226_v53, %v714_v25  ;;  %v1228_v4 = vmul.f32 0.5, %v972_v54  ;;  %v1229_v5 = vmul.f32 0.5, %v973_v55  ;;  %v467_v6 = vld [vmem:[%s2342_s29 + $0x758] sm:$0xff]  ;;  %1735 = vst [vmem:[%s2378_s21 + $0x6f8] sm:$0xff] %v1479_v59  ;;  %v975_v11 = vsub.f32 %v463_v50, %v719_v51 }
 0x104   : > { %v723_v7 = vld [vmem:[%s2350_s7 + $0x758] sm:$0xff]  ;;  %v468_v8 = vld [vmem:[%s2342_s29 + $0x760] sm:$0xff]  ;;  %1736 = vst [vmem:[%s2378_s21 + $0x700] sm:$0xff] %v1480_v60  ;;  %v1483_v9 = vadd.f32 %v1227_v61, %v715_v31  ;;  %v1230_v10 = vmul.f32 0.5, %v974_v62  ;;  %v976_v12 = vsub.f32 %v464_v56, %v720_v57  ;;  %v469_v14 = vld [vmem:[%s2342_s29 + $0x768] sm:$0xff]  ;;  %v977_v18 = vsub.f32 %v465_v58, %v721_v63 }
 0x105   : > { %v724_v13 = vld [vmem:[%s2350_s7 + $0x760] sm:$0xff]  ;;  %v725_v15 = vld [vmem:[%s2350_s7 + $0x768] sm:$0xff]  ;;  %1737 = vst [vmem:[%s2378_s21 + $0x708] sm:$0xff] %v1481_v2  ;;  %1738 = vst [vmem:[%s2378_s21 + $0x710] sm:$0xff] %v1482_v3  ;;  %v1484_v16 = vadd.f32 %v1228_v4, %v716_v37  ;;  %v1485_v17 = vadd.f32 %v1229_v5, %v717_v39  ;;  %v978_v19 = vsub.f32 %v466_v0, %v722_v1  ;;  %v1231_v23 = vmul.f32 0.5, %v975_v11 }
 0x106   : > { %v470_v20 = vld [vmem:[%s2342_s29 + $0x770] sm:$0xff]  ;;  %1739 = vst [vmem:[%s2378_s21 + $0x718] sm:$0xff] %v1483_v9  ;;  %v1486_v22 = vadd.f32 %v1230_v10, %v718_v45  ;;  %v1232_v24 = vmul.f32 0.5, %v976_v12  ;;  %v979_v25 = vsub.f32 %v467_v6, %v723_v7  ;;  %v471_v26 = vld [vmem:[%s2342_s29 + $0x778] sm:$0xff]  ;;  %v1233_v28 = vmul.f32 0.5, %v977_v18  ;;  %v472_v32 = vld [vmem:[%s2342_s29 + $0x780] sm:$0xff] }
 0x107   : > { %v726_v21 = vld [vmem:[%s2350_s7 + $0x770] sm:$0xff]  ;;  %v727_v27 = vld [vmem:[%s2350_s7 + $0x778] sm:$0xff]  ;;  %1740 = vst [vmem:[%s2378_s21 + $0x720] sm:$0xff] %v1484_v16  ;;  %1741 = vst [vmem:[%s2378_s21 + $0x728] sm:$0xff] %v1485_v17  ;;  %v1234_v29 = vmul.f32 0.5, %v978_v19  ;;  %v980_v30 = vsub.f32 %v468_v8, %v724_v13  ;;  %v981_v31 = vsub.f32 %v469_v14, %v725_v15  ;;  %v1487_v35 = vadd.f32 %v1231_v23, %v719_v51 }
 0x108   : > { %v728_v33 = vld [vmem:[%s2350_s7 + $0x780] sm:$0xff]  ;;  %v473_v34 = vld [vmem:[%s2342_s29 + $0x788] sm:$0xff]  ;;  %1742 = vst [vmem:[%s2378_s21 + $0x730] sm:$0xff] %v1486_v22  ;;  %v1488_v36 = vadd.f32 %v1232_v24, %v720_v57  ;;  %v1235_v37 = vmul.f32 0.5, %v979_v25  ;;  %v982_v38 = vsub.f32 %v470_v20, %v726_v21  ;;  %v474_v40 = vld [vmem:[%s2342_s29 + $0x790] sm:$0xff]  ;;  %v1489_v42 = vadd.f32 %v1233_v28, %v721_v63 }
 0x109   : > { %v729_v39 = vld [vmem:[%s2350_s7 + $0x788] sm:$0xff]  ;;  %v730_v41 = vld [vmem:[%s2350_s7 + $0x790] sm:$0xff]  ;;  %v1490_v43 = vadd.f32 %v1234_v29, %v722_v1  ;;  %v1236_v44 = vmul.f32 0.5, %v980_v30  ;;  %v1237_v45 = vmul.f32 0.5, %v981_v31  ;;  %v475_v46 = vld [vmem:[%s2342_s29 + $0x798] sm:$0xff]  ;;  %1743 = vst [vmem:[%s2378_s21 + $0x738] sm:$0xff] %v1487_v35  ;;  %v983_v51 = vsub.f32 %v471_v26, %v727_v27 }
 0x10a   : > { %v731_v47 = vld [vmem:[%s2350_s7 + $0x798] sm:$0xff]  ;;  %v476_v48 = vld [vmem:[%s2342_s29 + $0x7a0] sm:$0xff]  ;;  %1744 = vst [vmem:[%s2378_s21 + $0x740] sm:$0xff] %v1488_v36  ;;  %v1491_v49 = vadd.f32 %v1235_v37, %v723_v7  ;;  %v1238_v50 = vmul.f32 0.5, %v982_v38  ;;  %v984_v52 = vsub.f32 %v472_v32, %v728_v33  ;;  %v477_v54 = vld [vmem:[%s2342_s29 + $0x7a8] sm:$0xff]  ;;  %v985_v58 = vsub.f32 %v473_v34, %v729_v39 }
 0x10b   : > { %v732_v53 = vld [vmem:[%s2350_s7 + $0x7a0] sm:$0xff]  ;;  %v733_v55 = vld [vmem:[%s2350_s7 + $0x7a8] sm:$0xff]  ;;  %1745 = vst [vmem:[%s2378_s21 + $0x748] sm:$0xff] %v1489_v42  ;;  %1746 = vst [vmem:[%s2378_s21 + $0x750] sm:$0xff] %v1490_v43  ;;  %v1492_v56 = vadd.f32 %v1236_v44, %v724_v13  ;;  %v1493_v57 = vadd.f32 %v1237_v45, %v725_v15  ;;  %v986_v59 = vsub.f32 %v474_v40, %v730_v41  ;;  %v1239_v63 = vmul.f32 0.5, %v983_v51 }
 0x10c   : > { %v478_v60 = vld [vmem:[%s2342_s29 + $0x7b0] sm:$0xff]  ;;  %1747 = vst [vmem:[%s2378_s21 + $0x758] sm:$0xff] %v1491_v49  ;;  %v1494_v62 = vadd.f32 %v1238_v50, %v726_v21  ;;  %v1240_v0 = vmul.f32 0.5, %v984_v52  ;;  %v987_v1 = vsub.f32 %v475_v46, %v731_v47  ;;  %v479_v2 = vld [vmem:[%s2342_s29 + $0x7b8] sm:$0xff]  ;;  %v1241_v4 = vmul.f32 0.5, %v985_v58  ;;  %v480_v8 = vld [vmem:[%s2342_s29 + $0x7c0] sm:$0xff] }
 0x10d   : > { %v734_v61 = vld [vmem:[%s2350_s7 + $0x7b0] sm:$0xff]  ;;  %v735_v3 = vld [vmem:[%s2350_s7 + $0x7b8] sm:$0xff]  ;;  %1748 = vst [vmem:[%s2378_s21 + $0x760] sm:$0xff] %v1492_v56  ;;  %1749 = vst [vmem:[%s2378_s21 + $0x768] sm:$0xff] %v1493_v57  ;;  %v1242_v5 = vmul.f32 0.5, %v986_v59  ;;  %v988_v6 = vsub.f32 %v476_v48, %v732_v53  ;;  %v989_v7 = vsub.f32 %v477_v54, %v733_v55  ;;  %v1495_v11 = vadd.f32 %v1239_v63, %v727_v27 }
 0x10e   : > { %v736_v9 = vld [vmem:[%s2350_s7 + $0x7c0] sm:$0xff]  ;;  %v481_v10 = vld [vmem:[%s2342_s29 + $0x7c8] sm:$0xff]  ;;  %1750 = vst [vmem:[%s2378_s21 + $0x770] sm:$0xff] %v1494_v62  ;;  %v1496_v12 = vadd.f32 %v1240_v0, %v728_v33  ;;  %v1243_v13 = vmul.f32 0.5, %v987_v1  ;;  %v990_v14 = vsub.f32 %v478_v60, %v734_v61  ;;  %v482_v16 = vld [vmem:[%s2342_s29 + $0x7d0] sm:$0xff]  ;;  %v1497_v18 = vadd.f32 %v1241_v4, %v729_v39 }
 0x10f   : > { %v737_v15 = vld [vmem:[%s2350_s7 + $0x7c8] sm:$0xff]  ;;  %v738_v17 = vld [vmem:[%s2350_s7 + $0x7d0] sm:$0xff]  ;;  %v1498_v19 = vadd.f32 %v1242_v5, %v730_v41  ;;  %v1244_v20 = vmul.f32 0.5, %v988_v6  ;;  %v1245_v21 = vmul.f32 0.5, %v989_v7  ;;  %v483_v22 = vld [vmem:[%s2342_s29 + $0x7d8] sm:$0xff]  ;;  %1751 = vst [vmem:[%s2378_s21 + $0x778] sm:$0xff] %v1495_v11  ;;  %v991_v27 = vsub.f32 %v479_v2, %v735_v3 }
 0x110   : > { %v739_v23 = vld [vmem:[%s2350_s7 + $0x7d8] sm:$0xff]  ;;  %v484_v24 = vld [vmem:[%s2342_s29 + $0x7e0] sm:$0xff]  ;;  %1752 = vst [vmem:[%s2378_s21 + $0x780] sm:$0xff] %v1496_v12  ;;  %v1499_v25 = vadd.f32 %v1243_v13, %v731_v47  ;;  %v1246_v26 = vmul.f32 0.5, %v990_v14  ;;  %v992_v28 = vsub.f32 %v480_v8, %v736_v9  ;;  %v485_v30 = vld [vmem:[%s2342_s29 + $0x7e8] sm:$0xff]  ;;  %v993_v34 = vsub.f32 %v481_v10, %v737_v15 }
 0x111   : > { %v740_v29 = vld [vmem:[%s2350_s7 + $0x7e0] sm:$0xff]  ;;  %v741_v31 = vld [vmem:[%s2350_s7 + $0x7e8] sm:$0xff]  ;;  %1753 = vst [vmem:[%s2378_s21 + $0x788] sm:$0xff] %v1497_v18  ;;  %1754 = vst [vmem:[%s2378_s21 + $0x790] sm:$0xff] %v1498_v19  ;;  %v1500_v32 = vadd.f32 %v1244_v20, %v732_v53  ;;  %v1501_v33 = vadd.f32 %v1245_v21, %v733_v55  ;;  %v994_v35 = vsub.f32 %v482_v16, %v738_v17  ;;  %v1247_v39 = vmul.f32 0.5, %v991_v27 }
 0x112   : > { %v486_v36 = vld [vmem:[%s2342_s29 + $0x7f0] sm:$0xff]  ;;  %1755 = vst [vmem:[%s2378_s21 + $0x798] sm:$0xff] %v1499_v25  ;;  %v1502_v38 = vadd.f32 %v1246_v26, %v734_v61  ;;  %v1248_v40 = vmul.f32 0.5, %v992_v28  ;;  %v995_v41 = vsub.f32 %v483_v22, %v739_v23  ;;  %v1249_v42 = vmul.f32 0.5, %v993_v34  ;;  %v487_v46 = vld [vmem:[%s2342_s29 + $0x7f8] sm:$0xff] }
 0x113   : > { %v742_v37 = vld [vmem:[%s2350_s7 + $0x7f0] sm:$0xff]  ;;  %1756 = vst [vmem:[%s2378_s21 + $0x7a0] sm:$0xff] %v1500_v32  ;;  %1757 = vst [vmem:[%s2378_s21 + $0x7a8] sm:$0xff] %v1501_v33  ;;  %v1250_v43 = vmul.f32 0.5, %v994_v35  ;;  %v996_v44 = vsub.f32 %v484_v24, %v740_v29  ;;  %v997_v45 = vsub.f32 %v485_v30, %v741_v31  ;;  %v743_v47 = vld [vmem:[%s2350_s7 + $0x7f8] sm:$0xff]  ;;  %v1503_v48 = vadd.f32 %v1247_v39, %v735_v3 }
 0x114   : > { %1758 = vst [vmem:[%s2378_s21 + $0x7b0] sm:$0xff] %v1502_v38  ;;  %v1504_v49 = vadd.f32 %v1248_v40, %v736_v9  ;;  %v1251_v50 = vmul.f32 0.5, %v995_v41  ;;  %v998_v51 = vsub.f32 %v486_v36, %v742_v37  ;;  %v1505_v52 = vadd.f32 %v1249_v42, %v737_v15 }
 0x115   : > { %v1506_v53 = vadd.f32 %v1250_v43, %v738_v17  ;;  %v1252_v54 = vmul.f32 0.5, %v996_v44  ;;  %v1253_v55 = vmul.f32 0.5, %v997_v45  ;;  %1759 = vst [vmem:[%s2378_s21 + $0x7b8] sm:$0xff] %v1503_v48  ;;  %v999_v58 = vsub.f32 %v487_v46, %v743_v47 }
 0x116   : > { %1760 = vst [vmem:[%s2378_s21 + $0x7c0] sm:$0xff] %v1504_v49  ;;  %v1507_v56 = vadd.f32 %v1251_v50, %v739_v23  ;;  %v1254_v57 = vmul.f32 0.5, %v998_v51  ;;  %1761 = vst [vmem:[%s2378_s21 + $0x7c8] sm:$0xff] %v1505_v52 }
 0x117   : > { %1762 = vst [vmem:[%s2378_s21 + $0x7d0] sm:$0xff] %v1506_v53  ;;  %v1508_v59 = vadd.f32 %v1252_v54, %v740_v29  ;;  %v1509_v60 = vadd.f32 %v1253_v55, %v741_v31  ;;  %v1255_v62 = vmul.f32 0.5, %v999_v58 }
 0x118   : > { %1763 = vst [vmem:[%s2378_s21 + $0x7d8] sm:$0xff] %v1507_v56  ;;  %v1510_v61 = vadd.f32 %v1254_v57, %v742_v37 }
 0x119   : > { %1764 = vst [vmem:[%s2378_s21 + $0x7e0] sm:$0xff] %v1508_v59  ;;  %1765 = vst [vmem:[%s2378_s21 + $0x7e8] sm:$0xff] %v1509_v60  ;;  %v1511_v63 = vadd.f32 %v1255_v62, %v743_v47 }
 0x11a   : > { %1766 = vst [vmem:[%s2378_s21 + $0x7f0] sm:$0xff] %v1510_v61 }
 0x11b   : > { %1767 = vst [vmem:[%s2378_s21 + $0x7f8] sm:$0xff] %v1511_v63 }
 0x11c   : > { %2070 = shalt.err (!%p2067_p11)
}
 0x11d   : > { %s2071_s20 = scalar_lea.hbm %s3130_s30, 32768  ;;  %s2075_s5 = scalar_lea.hbm %s3185_s2, 65536 }
 0x11e   : > { %p2072_p1 = scmp.ne.s32.totalorder %s3130_s30, %s2071_s20  ;;  %p2076_p5 = scmp.lt.u32.totalorder %s3130_s30, %s3185_s2 }
 0x11f   : > { %p2077_p4 = scmp.lt.u32.totalorder %s2075_s5, %s2071_s20  ;;  %p2079_p0 = scmp.lt.u32.totalorder %s2071_s20, %s3130_s30 }
 0x120   : > { %p2073_p6 = pnand %p2072_p1, %p3196_p3 }
 0x121   : > { %p2078_p8 = por %p2077_p4, %p2076_p5 }
 0x122   : > { %p2074_p2 = pneg %p2073_p6 }
 0x123   : > { %p2080_p12 = por %p2079_p0, %p2078_p8 }
 0x125   : > { %p2081_p13 = pnand %p2080_p12, %p2074_p2 }
 0x127   : > { %2084 = shalt.err (!%p2081_p13)
}
 0x128   : > { %s2150_s7 = smov 1024   ;;  %s2151_s21 = smov 64  }
 0x129   : > { %1930 = dma.vmem_to_hbm [thread:$0]  (%p3196_p3), %s3132_s18, 32768, %s3130_s30, %s1769_s12, %s2150_s7, %s2150_s7, %s2151_s21  }
 0x12a PF: > { %s1800_s8 = sand.u32 1, %s2123_s9   ;;  %p3197_p7 = scmp.ne.s32.totalorder %s3191_s24, 0 }
 0x12b   : > { %p3198_p10 = scmp.ge.s32.totalorder %s2143_s14, 2  ;;  %s1801_s19 = scalar_lea.sflag [#allocation4], %s1800_s8 }
 0x12d   : > { %p1940_p9 = pnand %p3198_p10, %p3197_p7 }
 0x12f   : > { %2118 = dma.done.wait (!%p1940_p9), %s1801_s19, 32768  }
 0x130   : > { %2120 = vsyncadd (!%p1940_p9), %s1801_s19, 4294934528  ;;  %s21_s14 = sadd.s32 1, %s2143_s14   ;;  %s3199_s9 = smov %s2127_s10 }
 0x131   : > { %p18_p11 = scmp.ge.s32.totalorder %s21_s14, 4   ;;  %s3200_s10 = smov %s2131_s11 }
 0x132   : > { %s3201_s11 = smov %s2223_s23  ;;  %s3202_s12 = smov %s2139_s13 }
 0x133   : > { %s3203_s13 = smov %s3205_s17  ;;  %20 = sbr.rel (!%p18_p11) target bundleno = 8 (0x8), region = 86 }
 0x13a   :  { %1806 = vsyncpa [#allocation3], 1 }
 0x13b   :  { %1808 = vsyncpa [#allocation3 + $0x1], 1 }
 0x13c   :  { %1809 = vsyncpa [#allocation6], 1 }
 0x13d   :  { %1811 = vsyncpa [#allocation6 + $0x1], 1 }
 0x13e   :  { %1812 = vsyncpa [#allocation4], 1 }
 0x13f   :  { %1814 = vsyncpa [#allocation4 + $0x1], 1 }

</bundles_post_ra>
